<compile_context>
chip_gen: v7x
topology: tpu7x:2x2x1
jax: 0.10.0
libtpu: 0.0.40
codegen_flags: <defaults>
</compile_context>

<pallas_src>
import functools

import jax
import jax.numpy as jnp
from jax import lax
from jax.experimental import pallas as pl
from jax.experimental.pallas import tpu as pltpu

EPS_GINE = 0.0      # GINEConv default (train_eps=False, eps=0)
BN_EPS = 1e-5       # nn.BatchNorm1d default eps

LANE = 128
SUBLANE_BF16 = 16   # bf16 packs 16 sublanes per vreg


def _round_up(n, m):
    return ((n + m - 1) // m) * m


# ----------------------------------------------------------------------------
# Fused Pallas kernel: all GINE layers + global_mean_pool + BatchNorm + sigmoid
# ----------------------------------------------------------------------------
def _fused_gnn_kernel(x_ref, g_ref, dt_ref, ea_ref,
                      we_cat_ref, be_cat_ref, wn_ref, bn_ref,
                      p_ref, invcnt_ref, gamma_ref, beta_ref, mean_ref, var_ref,
                      o_ref, *, num_layers, c_pad):
    # Layer-invariant edge projection for ALL layers at once:
    #   e_all[:, l*C : (l+1)*C] = Lin_e^l(edge_attr)        [E_pad, L*C_pad] f32
    e_all = jnp.dot(ea_ref[...], we_cat_ref[...],
                    preferred_element_type=jnp.float32) + be_cat_ref[...]

    h = x_ref[...]                                  # [N_pad, C_pad] f32 node state

    for layer in range(num_layers):                 # statically unrolled
        h_bf = h.astype(jnp.bfloat16)
        # gather source-node features per edge: x_j = G @ h   (bf16 MXU, f32 acc)
        xj = jnp.dot(g_ref[...], h_bf, preferred_element_type=jnp.float32)
        # static, 128-aligned lane slice of the pre-computed edge projections
        e = e_all[:, layer * c_pad:(layer + 1) * c_pad]
        # GINE message (f32 on VPU)
        m = jnp.maximum(xj + e, 0.0)
        # scatter-sum onto target nodes: plain matmul with pre-transposed D^T
        aggr = jnp.dot(dt_ref[...], m.astype(jnp.bfloat16),
                       preferred_element_type=jnp.float32)   # [N_pad, C_pad]
        h_in = ((1.0 + EPS_GINE) * h + aggr).astype(jnp.bfloat16)
        # the conv's nn: Linear (+ ReLU for all but the last layer).
        # The extra F.relu in SimpleGNN.forward is idempotent on top of the
        # nn's ReLU, so a single ReLU here matches the PyTorch semantics.
        h = jnp.dot(h_in, wn_ref[layer],
                    preferred_element_type=jnp.float32) + bn_ref[layer]
        if layer < num_layers - 1:
            h = jnp.maximum(h, 0.0)

    # global_mean_pool: 0/1 one-hot bf16 matmul (f32 acc) + exact f32 1/count
    pooled = jnp.dot(p_ref[...], h.astype(jnp.bfloat16),
                     preferred_element_type=jnp.float32) * invcnt_ref[...]

    # BatchNorm1d (eval-mode running stats) + exact sigmoid on the tiny tile.
    # TODO(synk): training-mode batch statistics over the pooled batch are not used.
    inv = lax.rsqrt(var_ref[...] + BN_EPS)
    y = (pooled - mean_ref[...]) * inv * gamma_ref[...] + beta_ref[...]
    o_ref[...] = 1.0 / (1.0 + jnp.exp(-y))


# ----------------------------------------------------------------------------
# Python wrapper around the single pallas_call (no grid, single-buffered VMEM)
# ----------------------------------------------------------------------------
def fused_forward(x_p, G, Dt, ea_p, We_cat, be_cat, Wn_s, bn_s,
                  P, invcnt, gamma, beta, mean, var, *, num_layers, c_pad):
    b_pad = P.shape[0]
    args = (x_p, G, Dt, ea_p, We_cat, be_cat, Wn_s, bn_s,
            P, invcnt, gamma, beta, mean, var)

    out_bytes = b_pad * c_pad * 4
    arg_bytes = sum(int(a.size) * a.dtype.itemsize for a in args)
    # single-buffered operands + intermediates + headroom
    vmem_limit = int(3 * (arg_bytes + out_bytes) + (8 << 20))

    vspec = pl.BlockSpec(memory_space=pltpu.MemorySpace.VMEM)
    kernel = functools.partial(_fused_gnn_kernel,
                               num_layers=num_layers, c_pad=c_pad)
    return pl.pallas_call(
        kernel,
        out_shape=jax.ShapeDtypeStruct((b_pad, c_pad), jnp.float32),
        in_specs=[vspec] * len(args),
        out_specs=vspec,
        compiler_params=pltpu.CompilerParams(vmem_limit_bytes=vmem_limit),
    )(*args)


# ----------------------------------------------------------------------------
# Host-side packing: padding to lane-dense shapes, bf16 casts, weight packing
# ----------------------------------------------------------------------------
def _pad2(a, rows, cols, dtype=None):
    dt = a.dtype if dtype is None else dtype
    out = jnp.zeros((rows, cols), dt)
    return out.at[:a.shape[0], :a.shape[1]].set(a.astype(dt))


def _pack_convs(convs, c_pad, ed_pad):
    # Edge-projection weights concatenated along the output dim (one wide matmul).
    We_cat = jnp.concatenate(
        [_pad2(c["We"], ed_pad, c_pad, jnp.bfloat16) for c in convs], axis=1)
    be_cat = jnp.concatenate(
        [_pad2(c["be"].reshape(1, -1), 1, c_pad) for c in convs], axis=1)
    # Per-layer node-update weights stay stacked (they multiply layer state).
    Wn_s = jnp.stack([_pad2(c["Wn"], c_pad, c_pad, jnp.bfloat16) for c in convs])
    bn_s = jnp.stack([_pad2(c["bn"].reshape(1, -1), 1, c_pad) for c in convs])
    return We_cat, be_cat, Wn_s, bn_s


def _pack_norm(norm, c_pad):
    gamma = _pad2(norm["gamma"].reshape(1, -1), 1, c_pad)
    beta = _pad2(norm["beta"].reshape(1, -1), 1, c_pad)
    mean = _pad2(norm["running_mean"].reshape(1, -1), 1, c_pad)
    nv = norm["running_var"].reshape(1, -1)
    var = jnp.ones((1, c_pad), jnp.float32).at[:, :nv.shape[1]].set(nv)
    return gamma, beta, mean, var


def _dense_operators(edge_index, batch, num_nodes, num_graphs,
                     n_pad, e_pad, b_pad):
    src, dst = edge_index[0], edge_index[1]
    E = src.shape[0]
    # gather operator G [E_pad, N_pad]: one-hot(src)
    G = jnp.zeros((e_pad, n_pad), jnp.bfloat16).at[:E].set(
        jax.nn.one_hot(src, n_pad, dtype=jnp.bfloat16))
    # scatter operator pre-transposed on the host: D^T [N_pad, E_pad]
    Dt = jnp.zeros((n_pad, e_pad), jnp.bfloat16).at[:, :E].set(
        jax.nn.one_hot(dst, n_pad, dtype=jnp.bfloat16).T)
    # pool operator: pure 0/1 one-hot (bf16) + exact f32 1/count, kept separate
    onehot_b = jax.nn.one_hot(batch, num_graphs, dtype=jnp.float32)   # [N, B]
    counts = jnp.sum(onehot_b, axis=0)                                # [B]
    P = jnp.zeros((b_pad, n_pad), jnp.bfloat16).at[:num_graphs, :num_nodes].set(
        onehot_b.T.astype(jnp.bfloat16))
    inv_small = jnp.where(counts > 0, 1.0 / counts, 0.0)              # [B] f32
    return G, Dt, P, inv_small


def simple_gnn_forward(params, x, edge_index, edge_attr, batch, num_graphs):
    N = x.shape[0]
    E = edge_index.shape[1]
    B = num_graphs
    L = len(params["convs"])

    c_dims = [x.shape[1]] + [c["Wn"].shape[1] for c in params["convs"]]
    c_pad = _round_up(max(c_dims), LANE)
    ed_pad = _round_up(edge_attr.shape[1], LANE)
    n_pad = _round_up(N, LANE)
    e_pad = _round_up(E, LANE)           # E is a lane dim of D^T -> 128-aligned
    b_pad = _round_up(B, SUBLANE_BF16)   # bf16 pool one-hot: 16-sublane tile

    G, Dt, P, inv_small = _dense_operators(edge_index, batch, N, B,
                                           n_pad, e_pad, b_pad)
    invcnt = jnp.zeros((b_pad, c_pad), jnp.float32).at[:B, :].set(
        inv_small[:, None])

    x_p = _pad2(x, n_pad, c_pad)                          # f32 node features
    ea_p = _pad2(edge_attr, e_pad, ed_pad, jnp.bfloat16)  # bf16 edge attrs
    We_cat, be_cat, Wn_s, bn_s = _pack_convs(params["convs"], c_pad, ed_pad)
    gamma, beta, mean, var = _pack_norm(params["norm"], c_pad)

    out = fused_forward(x_p, G, Dt, ea_p, We_cat, be_cat, Wn_s, bn_s,
                        P, invcnt, gamma, beta, mean, var,
                        num_layers=L, c_pad=c_pad)
    return out[:B, :1]


# ----------------------------------------------------------------------------
# Deterministic parameter / input construction
# ----------------------------------------------------------------------------
def init_params(key, in_channels, hidden_channels, num_layers, edge_dim):
    dims = ([(in_channels, hidden_channels)]
            + [(hidden_channels, hidden_channels)] * (num_layers - 2)
            + [(hidden_channels, 1)])
    convs = []
    for (cin, cout) in dims:
        key, k1, k2, k3, k4 = jax.random.split(key, 5)
        convs.append({
            # GINEConv's internal edge projection: Linear(edge_dim, cin)
            "We": 0.1 * jax.random.normal(k1, (edge_dim, cin), jnp.float32),
            "be": 0.1 * jax.random.normal(k2, (cin,), jnp.float32),
            # the conv's nn: Linear(cin, cout)
            "Wn": 0.1 * jax.random.normal(k3, (cin, cout), jnp.float32),
            "bn": 0.1 * jax.random.normal(k4, (cout,), jnp.float32),
        })
    norm = {
        "gamma": jnp.ones((1,), jnp.float32),
        "beta": jnp.zeros((1,), jnp.float32),
        "running_mean": jnp.zeros((1,), jnp.float32),
        "running_var": jnp.ones((1,), jnp.float32),
    }
    return {"convs": convs, "norm": norm}


def build_graph_structure(num_graphs, nodes_per_graph):
    """Bidirectional ring per graph; returns edge_index [2,E] and batch [N]."""
    srcs, dsts = [], []
    for g in range(num_graphs):
        base = g * nodes_per_graph
        for i in range(nodes_per_graph):
            a = base + i
            b = base + (i + 1) % nodes_per_graph
            srcs += [a, b]
            dsts += [b, a]
    edge_index = jnp.array([srcs, dsts], dtype=jnp.int32)
    batch = jnp.repeat(jnp.arange(num_graphs, dtype=jnp.int32), nodes_per_graph)
    return edge_index, batch


# ----------------------------------------------------------------------------
if __name__ == "__main__":
    in_channels, hidden_channels, num_layers, edge_dim = 4, 32, 3, 4
    num_graphs, nodes_per_graph = 2, 8
    num_nodes = num_graphs * nodes_per_graph

    key = jax.random.PRNGKey(0)
    k_params, k_x, k_e = jax.random.split(key, 3)

    params = init_params(k_params, in_channels, hidden_channels,
                         num_layers, edge_dim)

    edge_index, batch = build_graph_structure(num_graphs, nodes_per_graph)
    num_edges = edge_index.shape[1]

    x = jax.random.normal(k_x, (num_nodes, in_channels), jnp.float32)
    edge_attr = jax.random.normal(k_e, (num_edges, edge_dim), jnp.float32)

    out = simple_gnn_forward(params, x, edge_index, edge_attr, batch, num_graphs)
    out = jax.block_until_ready(out)

    assert out.shape == (num_graphs, 1)
    assert bool(jnp.all(jnp.isfinite(out)))
    assert bool(jnp.all((out > 0.0) & (out < 1.0)))
    print("KERNEL_OK")
</pallas_src>

<mosaic_0001>
module attributes {stable_mosaic.version = 11 : i64} {
  func.func @_fused_gnn_kernel(%arg0: memref<128x128xf32, #tpu.memory_space<vmem>>, %arg1: memref<128x128xbf16, #tpu.memory_space<vmem>>, %arg2: memref<128x128xbf16, #tpu.memory_space<vmem>>, %arg3: memref<128x128xbf16, #tpu.memory_space<vmem>>, %arg4: memref<128x384xbf16, #tpu.memory_space<vmem>>, %arg5: memref<1x384xf32, #tpu.memory_space<vmem>>, %arg6: memref<3x128x128xbf16, #tpu.memory_space<vmem>>, %arg7: memref<3x1x128xf32, #tpu.memory_space<vmem>>, %arg8: memref<16x128xbf16, #tpu.memory_space<vmem>>, %arg9: memref<16x128xf32, #tpu.memory_space<vmem>>, %arg10: memref<1x128xf32, #tpu.memory_space<vmem>>, %arg11: memref<1x128xf32, #tpu.memory_space<vmem>>, %arg12: memref<1x128xf32, #tpu.memory_space<vmem>>, %arg13: memref<1x128xf32, #tpu.memory_space<vmem>>, %arg14: memref<16x128xf32, #tpu.memory_space<vmem>>) attributes {dimension_semantics = [], scalar_prefetch = 0 : i64, scratch_operands = 0 : i64, tpu.core_type = #tpu.core_type<tc>} {
    %c0 = arith.constant 0 : index
    %c0_0 = arith.constant 0 : index
    %0 = vector.load %arg3[%c0, %c0_0] : memref<128x128xbf16, #tpu.memory_space<vmem>>, vector<128x128xbf16>
    %c0_1 = arith.constant 0 : index
    %c0_2 = arith.constant 0 : index
    %1 = vector.load %arg4[%c0_1, %c0_2] : memref<128x384xbf16, #tpu.memory_space<vmem>>, vector<128x384xbf16>
    %cst = arith.constant dense<0.000000e+00> : vector<128x384xf32>
    %2 = tpu.matmul %0, %1, %cst {dimension_numbers = #tpu.dot_dimension_numbers<[1], [0], [0], [1], [0, 0, 1, 1], [], []>} : vector<128x128xbf16>, vector<128x384xbf16>, vector<128x384xf32> -> vector<128x384xf32>
    %c0_3 = arith.constant 0 : index
    %c0_4 = arith.constant 0 : index
    %3 = vector.load %arg5[%c0_3, %c0_4] : memref<1x384xf32, #tpu.memory_space<vmem>>, vector<1x384xf32>
    %4 = vector.broadcast %3 : vector<1x384xf32> to vector<128x384xf32>
    %5 = arith.addf %2, %4 : vector<128x384xf32>
    %c0_5 = arith.constant 0 : index
    %c0_6 = arith.constant 0 : index
    %6 = vector.load %arg0[%c0_5, %c0_6] : memref<128x128xf32, #tpu.memory_space<vmem>>, vector<128x128xf32>
    %7 = arith.truncf %6 : vector<128x128xf32> to vector<128x128xbf16>
    %c0_7 = arith.constant 0 : index
    %c0_8 = arith.constant 0 : index
    %8 = vector.load %arg1[%c0_7, %c0_8] : memref<128x128xbf16, #tpu.memory_space<vmem>>, vector<128x128xbf16>
    %cst_9 = arith.constant dense<0.000000e+00> : vector<128x128xf32>
    %9 = tpu.matmul %8, %7, %cst_9 {dimension_numbers = #tpu.dot_dimension_numbers<[1], [0], [0], [1], [0, 0, 1, 1], [], []>} : vector<128x128xbf16>, vector<128x128xbf16>, vector<128x128xf32> -> vector<128x128xf32>
    %10 = vector.extract_strided_slice %5 {offsets = [0, 0], sizes = [128, 128], strides = [1, 1]} : vector<128x384xf32> to vector<128x128xf32>
    %11 = arith.addf %9, %10 : vector<128x128xf32>
    %cst_10 = arith.constant 0.000000e+00 : f32
    %12 = vector.broadcast %cst_10 : f32 to vector<128x128xf32>
    %13 = arith.maximumf %11, %12 : vector<128x128xf32>
    %c0_11 = arith.constant 0 : index
    %c0_12 = arith.constant 0 : index
    %14 = vector.load %arg2[%c0_11, %c0_12] : memref<128x128xbf16, #tpu.memory_space<vmem>>, vector<128x128xbf16>
    %15 = arith.truncf %13 : vector<128x128xf32> to vector<128x128xbf16>
    %cst_13 = arith.constant dense<0.000000e+00> : vector<128x128xf32>
    %16 = tpu.matmul %14, %15, %cst_13 {dimension_numbers = #tpu.dot_dimension_numbers<[1], [0], [0], [1], [0, 0, 1, 1], [], []>} : vector<128x128xbf16>, vector<128x128xbf16>, vector<128x128xf32> -> vector<128x128xf32>
    %cst_14 = arith.constant 1.000000e+00 : f32
    %17 = vector.broadcast %cst_14 : f32 to vector<128x128xf32>
    %18 = arith.mulf %17, %6 : vector<128x128xf32>
    %19 = arith.addf %18, %16 : vector<128x128xf32>
    %20 = arith.truncf %19 : vector<128x128xf32> to vector<128x128xbf16>
    %c0_15 = arith.constant 0 : index
    %c0_16 = arith.constant 0 : index
    %c0_17 = arith.constant 0 : index
    %21 = vector.load %arg6[%c0_15, %c0_16, %c0_17] : memref<3x128x128xbf16, #tpu.memory_space<vmem>>, vector<1x128x128xbf16>
    %22 = vector.shape_cast %21 : vector<1x128x128xbf16> to vector<128x128xbf16>
    %cst_18 = arith.constant dense<0.000000e+00> : vector<128x128xf32>
    %23 = tpu.matmul %20, %22, %cst_18 {dimension_numbers = #tpu.dot_dimension_numbers<[1], [0], [0], [1], [0, 0, 1, 1], [], []>} : vector<128x128xbf16>, vector<128x128xbf16>, vector<128x128xf32> -> vector<128x128xf32>
    %c0_19 = arith.constant 0 : index
    %c0_20 = arith.constant 0 : index
    %c0_21 = arith.constant 0 : index
    %24 = vector.load %arg7[%c0_19, %c0_20, %c0_21] : memref<3x1x128xf32, #tpu.memory_space<vmem>>, vector<1x1x128xf32>
    %25 = vector.shape_cast %24 : vector<1x1x128xf32> to vector<1x128xf32>
    %26 = vector.broadcast %25 : vector<1x128xf32> to vector<128x128xf32>
    %27 = arith.addf %23, %26 : vector<128x128xf32>
    %cst_22 = arith.constant 0.000000e+00 : f32
    %28 = vector.broadcast %cst_22 : f32 to vector<128x128xf32>
    %29 = arith.maximumf %27, %28 : vector<128x128xf32>
    %30 = arith.truncf %29 : vector<128x128xf32> to vector<128x128xbf16>
    %c0_23 = arith.constant 0 : index
    %c0_24 = arith.constant 0 : index
    %31 = vector.load %arg1[%c0_23, %c0_24] : memref<128x128xbf16, #tpu.memory_space<vmem>>, vector<128x128xbf16>
    %cst_25 = arith.constant dense<0.000000e+00> : vector<128x128xf32>
    %32 = tpu.matmul %31, %30, %cst_25 {dimension_numbers = #tpu.dot_dimension_numbers<[1], [0], [0], [1], [0, 0, 1, 1], [], []>} : vector<128x128xbf16>, vector<128x128xbf16>, vector<128x128xf32> -> vector<128x128xf32>
    %33 = vector.extract_strided_slice %5 {offsets = [0, 128], sizes = [128, 128], strides = [1, 1]} : vector<128x384xf32> to vector<128x128xf32>
    %34 = arith.addf %32, %33 : vector<128x128xf32>
    %cst_26 = arith.constant 0.000000e+00 : f32
    %35 = vector.broadcast %cst_26 : f32 to vector<128x128xf32>
    %36 = arith.maximumf %34, %35 : vector<128x128xf32>
    %c0_27 = arith.constant 0 : index
    %c0_28 = arith.constant 0 : index
    %37 = vector.load %arg2[%c0_27, %c0_28] : memref<128x128xbf16, #tpu.memory_space<vmem>>, vector<128x128xbf16>
    %38 = arith.truncf %36 : vector<128x128xf32> to vector<128x128xbf16>
    %cst_29 = arith.constant dense<0.000000e+00> : vector<128x128xf32>
    %39 = tpu.matmul %37, %38, %cst_29 {dimension_numbers = #tpu.dot_dimension_numbers<[1], [0], [0], [1], [0, 0, 1, 1], [], []>} : vector<128x128xbf16>, vector<128x128xbf16>, vector<128x128xf32> -> vector<128x128xf32>
    %cst_30 = arith.constant 1.000000e+00 : f32
    %40 = vector.broadcast %cst_30 : f32 to vector<128x128xf32>
    %41 = arith.mulf %40, %29 : vector<128x128xf32>
    %42 = arith.addf %41, %39 : vector<128x128xf32>
    %43 = arith.truncf %42 : vector<128x128xf32> to vector<128x128xbf16>
    %c1 = arith.constant 1 : index
    %c0_31 = arith.constant 0 : index
    %c0_32 = arith.constant 0 : index
    %44 = vector.load %arg6[%c1, %c0_31, %c0_32] : memref<3x128x128xbf16, #tpu.memory_space<vmem>>, vector<1x128x128xbf16>
    %45 = vector.shape_cast %44 : vector<1x128x128xbf16> to vector<128x128xbf16>
    %cst_33 = arith.constant dense<0.000000e+00> : vector<128x128xf32>
    %46 = tpu.matmul %43, %45, %cst_33 {dimension_numbers = #tpu.dot_dimension_numbers<[1], [0], [0], [1], [0, 0, 1, 1], [], []>} : vector<128x128xbf16>, vector<128x128xbf16>, vector<128x128xf32> -> vector<128x128xf32>
    %c1_34 = arith.constant 1 : index
    %c0_35 = arith.constant 0 : index
    %c0_36 = arith.constant 0 : index
    %47 = vector.load %arg7[%c1_34, %c0_35, %c0_36] : memref<3x1x128xf32, #tpu.memory_space<vmem>>, vector<1x1x128xf32>
    %48 = vector.shape_cast %47 : vector<1x1x128xf32> to vector<1x128xf32>
    %49 = vector.broadcast %48 : vector<1x128xf32> to vector<128x128xf32>
    %50 = arith.addf %46, %49 : vector<128x128xf32>
    %cst_37 = arith.constant 0.000000e+00 : f32
    %51 = vector.broadcast %cst_37 : f32 to vector<128x128xf32>
    %52 = arith.maximumf %50, %51 : vector<128x128xf32>
    %53 = arith.truncf %52 : vector<128x128xf32> to vector<128x128xbf16>
    %c0_38 = arith.constant 0 : index
    %c0_39 = arith.constant 0 : index
    %54 = vector.load %arg1[%c0_38, %c0_39] : memref<128x128xbf16, #tpu.memory_space<vmem>>, vector<128x128xbf16>
    %cst_40 = arith.constant dense<0.000000e+00> : vector<128x128xf32>
    %55 = tpu.matmul %54, %53, %cst_40 {dimension_numbers = #tpu.dot_dimension_numbers<[1], [0], [0], [1], [0, 0, 1, 1], [], []>} : vector<128x128xbf16>, vector<128x128xbf16>, vector<128x128xf32> -> vector<128x128xf32>
    %56 = vector.extract_strided_slice %5 {offsets = [0, 256], sizes = [128, 128], strides = [1, 1]} : vector<128x384xf32> to vector<128x128xf32>
    %57 = arith.addf %55, %56 : vector<128x128xf32>
    %cst_41 = arith.constant 0.000000e+00 : f32
    %58 = vector.broadcast %cst_41 : f32 to vector<128x128xf32>
    %59 = arith.maximumf %57, %58 : vector<128x128xf32>
    %c0_42 = arith.constant 0 : index
    %c0_43 = arith.constant 0 : index
    %60 = vector.load %arg2[%c0_42, %c0_43] : memref<128x128xbf16, #tpu.memory_space<vmem>>, vector<128x128xbf16>
    %61 = arith.truncf %59 : vector<128x128xf32> to vector<128x128xbf16>
    %cst_44 = arith.constant dense<0.000000e+00> : vector<128x128xf32>
    %62 = tpu.matmul %60, %61, %cst_44 {dimension_numbers = #tpu.dot_dimension_numbers<[1], [0], [0], [1], [0, 0, 1, 1], [], []>} : vector<128x128xbf16>, vector<128x128xbf16>, vector<128x128xf32> -> vector<128x128xf32>
    %cst_45 = arith.constant 1.000000e+00 : f32
    %63 = vector.broadcast %cst_45 : f32 to vector<128x128xf32>
    %64 = arith.mulf %63, %52 : vector<128x128xf32>
    %65 = arith.addf %64, %62 : vector<128x128xf32>
    %66 = arith.truncf %65 : vector<128x128xf32> to vector<128x128xbf16>
    %c2 = arith.constant 2 : index
    %c0_46 = arith.constant 0 : index
    %c0_47 = arith.constant 0 : index
    %67 = vector.load %arg6[%c2, %c0_46, %c0_47] : memref<3x128x128xbf16, #tpu.memory_space<vmem>>, vector<1x128x128xbf16>
    %68 = vector.shape_cast %67 : vector<1x128x128xbf16> to vector<128x128xbf16>
    %cst_48 = arith.constant dense<0.000000e+00> : vector<128x128xf32>
    %69 = tpu.matmul %66, %68, %cst_48 {dimension_numbers = #tpu.dot_dimension_numbers<[1], [0], [0], [1], [0, 0, 1, 1], [], []>} : vector<128x128xbf16>, vector<128x128xbf16>, vector<128x128xf32> -> vector<128x128xf32>
    %c2_49 = arith.constant 2 : index
    %c0_50 = arith.constant 0 : index
    %c0_51 = arith.constant 0 : index
    %70 = vector.load %arg7[%c2_49, %c0_50, %c0_51] : memref<3x1x128xf32, #tpu.memory_space<vmem>>, vector<1x1x128xf32>
    %71 = vector.shape_cast %70 : vector<1x1x128xf32> to vector<1x128xf32>
    %72 = vector.broadcast %71 : vector<1x128xf32> to vector<128x128xf32>
    %73 = arith.addf %69, %72 : vector<128x128xf32>
    %c0_52 = arith.constant 0 : index
    %c0_53 = arith.constant 0 : index
    %74 = vector.load %arg8[%c0_52, %c0_53] : memref<16x128xbf16, #tpu.memory_space<vmem>>, vector<16x128xbf16>
    %75 = arith.truncf %73 : vector<128x128xf32> to vector<128x128xbf16>
    %cst_54 = arith.constant dense<0.000000e+00> : vector<16x128xf32>
    %76 = tpu.matmul %74, %75, %cst_54 {dimension_numbers = #tpu.dot_dimension_numbers<[1], [0], [0], [1], [0, 0, 1, 1], [], []>} : vector<16x128xbf16>, vector<128x128xbf16>, vector<16x128xf32> -> vector<16x128xf32>
    %c0_55 = arith.constant 0 : index
    %c0_56 = arith.constant 0 : index
    %77 = vector.load %arg9[%c0_55, %c0_56] : memref<16x128xf32, #tpu.memory_space<vmem>>, vector<16x128xf32>
    %78 = arith.mulf %76, %77 : vector<16x128xf32>
    %c0_57 = arith.constant 0 : index
    %c0_58 = arith.constant 0 : index
    %79 = vector.load %arg13[%c0_57, %c0_58] : memref<1x128xf32, #tpu.memory_space<vmem>>, vector<1x128xf32>
    %cst_59 = arith.constant 9.99999974E-6 : f32
    %80 = vector.broadcast %cst_59 : f32 to vector<1x128xf32>
    %81 = arith.addf %79, %80 : vector<1x128xf32>
    %82 = math.rsqrt %81 : vector<1x128xf32>
    %c0_60 = arith.constant 0 : index
    %c0_61 = arith.constant 0 : index
    %83 = vector.load %arg12[%c0_60, %c0_61] : memref<1x128xf32, #tpu.memory_space<vmem>>, vector<1x128xf32>
    %84 = vector.broadcast %83 : vector<1x128xf32> to vector<16x128xf32>
    %85 = arith.subf %78, %84 : vector<16x128xf32>
    %86 = vector.broadcast %82 : vector<1x128xf32> to vector<16x128xf32>
    %87 = arith.mulf %85, %86 : vector<16x128xf32>
    %c0_62 = arith.constant 0 : index
    %c0_63 = arith.constant 0 : index
    %88 = vector.load %arg10[%c0_62, %c0_63] : memref<1x128xf32, #tpu.memory_space<vmem>>, vector<1x128xf32>
    %89 = vector.broadcast %88 : vector<1x128xf32> to vector<16x128xf32>
    %90 = arith.mulf %87, %89 : vector<16x128xf32>
    %c0_64 = arith.constant 0 : index
    %c0_65 = arith.constant 0 : index
    %91 = vector.load %arg11[%c0_64, %c0_65] : memref<1x128xf32, #tpu.memory_space<vmem>>, vector<1x128xf32>
    %92 = vector.broadcast %91 : vector<1x128xf32> to vector<16x128xf32>
    %93 = arith.addf %90, %92 : vector<16x128xf32>
    %cst_66 = arith.constant 0.000000e+00 : f32
    %94 = vector.broadcast %cst_66 : f32 to vector<16x128xf32>
    %95 = arith.subf %94, %93 : vector<16x128xf32>
    %96 = math.exp %95 : vector<16x128xf32>
    %cst_67 = arith.constant 1.000000e+00 : f32
    %97 = vector.broadcast %cst_67 : f32 to vector<16x128xf32>
    %98 = arith.addf %97, %96 : vector<16x128xf32>
    %cst_68 = arith.constant 1.000000e+00 : f32
    %99 = vector.broadcast %cst_68 : f32 to vector<16x128xf32>
    %100 = arith.divf %99, %98 : vector<16x128xf32>
    %c0_69 = arith.constant 0 : index
    %c0_70 = arith.constant 0 : index
    %101 = vector.load %arg14[%c0_69, %c0_70] : memref<16x128xf32, #tpu.memory_space<vmem>>, vector<16x128xf32>
    tpu.vector_store %arg14[%c0_69, %c0_70], %100 {strides = array<i32>} : memref<16x128xf32, #tpu.memory_space<vmem>>, vector<16x128xf32>,
    return
  }
}

</mosaic_0001>

<bundles_post_ra>
// kernel: tpu_custom_call.1
= control target key start
LH: loop header
LB: loop body
LE: loop exit
PB: predicated region body
PF: predicated region fallthrough
CT: control target
= control target key end

     0   :  { %19 = vsyncpa [#allocation3], 0  ;;  %s3745_s0 = inlined_call_operand.hbm [shape: f32[128,128], index: 0, kind: input, shape index: {}]   ;;  %s3746_s1 = inlined_call_operand.hbm [shape: bf16[128,128], index: 1, kind: input, shape index: {}]   ;;  %s3747_s2 = inlined_call_operand.hbm [shape: bf16[128,128], index: 2, kind: input, shape index: {}]   ;;  %s3748_s3 = inlined_call_operand.hbm [shape: bf16[128,128], index: 3, kind: input, shape index: {}]   ;;  %s3749_s4 = inlined_call_operand.hbm [shape: bf16[128,384], index: 4, kind: input, shape index: {}]   ;;  %s3750_s5 = inlined_call_operand.vmem [shape: f32[1,384], index: 5, kind: input, shape index: {}]   ;;  %s3751_s6 = inlined_call_operand.hbm [shape: bf16[3,128,128], index: 6, kind: input, shape index: {}]   ;;  %s3752_s7 = inlined_call_operand.vmem [shape: f32[3,1,128], index: 7, kind: input, shape index: {}]   ;;  %s3753_s8 = inlined_call_operand.vmem [shape: bf16[16,128], index: 8, kind: input, shape index: {}]   ;;  %s3754_s9 = inlined_call_operand.vmem [shape: f32[16,128], index: 9, kind: input, shape index: {}]   ;;  %s3755_s10 = inlined_call_operand.vmem [shape: f32[1,128], index: 10, kind: input, shape index: {}]   ;;  %s3756_s11 = inlined_call_operand.vmem [shape: f32[1,128], index: 11, kind: input, shape index: {}]   ;;  %s3757_s12 = inlined_call_operand.vmem [shape: f32[1,128], index: 12, kind: input, shape index: {}]   ;;  %s3758_s13 = inlined_call_operand.vmem [shape: f32[1,128], index: 13, kind: input, shape index: {}]   ;;  %s3759_s14 = inlined_call_operand.hbm [shape: f32[16,128], index: 14, kind: output, shape index: {}]  }
   0x1   :  { %20 = vsyncpa [#allocation6], 0 }
   0x2   :  { %21 = vsyncpa [#allocation9], 0 }
   0x3   :  { %22 = vsyncpa [#allocation12], 0 }
   0x4   :  { %23 = vsyncpa [#allocation4], 0  ;;  %s3050_s29 = smov [#allocation5]   ;;  %s2886_s17 = scalar_lea.hbm %s3746_s1, 1024 }
   0x5   :  { %s41_s30 = sshll.u32 %s3050_s29, 4  ;;  %p2887_p0 = scmp.ne.s32.totalorder %s3746_s1, %s2886_s17  ;;  %s42_s30 = int_to_ptr.vmem [resolvable:$true] %s41_s30 }
   0x6   :  { %p2890_p1 = scmp.lt.u32.totalorder %s2886_s17, %s3746_s1 }
   0x8   :  { %p2892_p2 = pnand %p2890_p1, %p2887_p0 }
   0xa   :  { %2895 = shalt.err (!%p2892_p2)
}
   0xb   :  { %s2896_s22 = scalar_lea.vmem %s42_s30, 1024  ;;  %p2901_p4 = scmp.lt.s32.totalorder %s42_s30, %s42_s30 }
   0xc   :  { %p2897_p3 = scmp.ne.s32.totalorder %s42_s30, %s2896_s22  ;;  %p2902_p5 = scmp.lt.s32.totalorder %s2896_s22, %s2896_s22 }
   0xe   :  { %p2903_p6 = por %p2902_p5, %p2901_p4 }
  0x10   :  { %p2904_p7 = pnand %p2903_p6, %p2897_p3 }
  0x12   :  { %2907 = shalt.err (!%p2904_p7)
}
  0x13   :  { %s3051_s23 = smov 64   ;;  %s3052_s24 = smov 4  }
  0x14   :  { %47 = dma.hbm_to_vmem [thread:$0]  %s3746_s1, 1024, %s42_s30, [#allocation6], %s3051_s23, %s3051_s23, %s3052_s24  }
  0x15   :  { %s3053_s27 = smov [#allocation8]   ;;  %s3054_s29 = smov [#allocation2]  }
  0x16   :  { %s65_s28 = sshll.u32 %s3053_s27, 4  ;;  %s29_s15 = sshll.u32 %s3054_s29, 4  ;;  %s66_s28 = int_to_ptr.vmem [resolvable:$true] %s65_s28  ;;  %s30_s15 = int_to_ptr.vmem [resolvable:$true] %s29_s15 }
  0x17   :  { %s2908_s18 = scalar_lea.hbm %s3748_s3, 1024 }
  0x18   :  { %p2909_p8 = scmp.ne.s32.totalorder %s3748_s3, %s2908_s18  ;;  %p2912_p9 = scmp.lt.u32.totalorder %s2908_s18, %s3748_s3 }
  0x1a   :  { %p2914_p10 = pnand %p2912_p9, %p2909_p8 }
  0x1c   :  { %2917 = shalt.err (!%p2914_p10)
}
  0x1d   :  { %s2918_s1 = scalar_lea.vmem %s66_s28, 1024  ;;  %p2923_p12 = scmp.lt.s32.totalorder %s66_s28, %s66_s28 }
  0x1e   :  { %p2919_p11 = scmp.ne.s32.totalorder %s66_s28, %s2918_s1  ;;  %p2924_p13 = scmp.lt.s32.totalorder %s2918_s1, %s2918_s1 }
  0x20   :  { %p2925_p0 = por %p2924_p13, %p2923_p12 }
  0x22   :  { %p2926_p1 = pnand %p2925_p0, %p2919_p11 }
  0x24   :  { %2929 = shalt.err (!%p2926_p1)
}
  0x25   :  { %71 = dma.hbm_to_vmem [thread:$0]  %s3748_s3, 1024, %s66_s28, [#allocation9], %s3051_s23, %s3051_s23, %s3052_s24  }
  0x26   :  { %s2930_s29 = scalar_lea.hbm %s3745_s0, 2048 }
  0x27   :  { %p2931_p2 = scmp.ne.s32.totalorder %s3745_s0, %s2930_s29  ;;  %p2934_p3 = scmp.lt.u32.totalorder %s2930_s29, %s3745_s0 }
  0x29   :  { %p2936_p4 = pnand %p2934_p3, %p2931_p2 }
  0x2b   :  { %2939 = shalt.err (!%p2936_p4)
}
  0x2c   :  { %s2940_s20 = scalar_lea.vmem %s30_s15, 2048  ;;  %p2945_p6 = scmp.lt.s32.totalorder %s30_s15, %s30_s15 }
  0x2d   :  { %p2941_p5 = scmp.ne.s32.totalorder %s30_s15, %s2940_s20  ;;  %p2946_p7 = scmp.lt.s32.totalorder %s2940_s20, %s2940_s20 }
  0x2f   :  { %p2947_p8 = por %p2946_p7, %p2945_p6 }
  0x31   :  { %p2948_p9 = pnand %p2947_p8, %p2941_p5 }
  0x33   :  { %2951 = shalt.err (!%p2948_p9)
}
  0x34   :  { %s3055_s3 = smov 128   ;;  %s3056_s28 = smov 8  }
  0x35   :  { %35 = dma.hbm_to_vmem [thread:$0]  %s3745_s0, 2048, %s30_s15, [#allocation3], %s3055_s3, %s3055_s3, %s3056_s28  }
  0x36   :  { %s3057_s1 = smov [#allocation7]   ;;  %s3058_s25 = smov [#allocation10]  }
  0x37   :  { %s53_s30 = sshll.u32 %s3057_s1, 4  ;;  %s77_s26 = sshll.u32 %s3058_s25, 4  ;;  %s54_s30 = int_to_ptr.vmem [resolvable:$true] %s53_s30  ;;  %s78_s26 = int_to_ptr.vmem [resolvable:$true] %s77_s26 }
  0x38   :  { %s2952_s16 = scalar_lea.hbm %s3747_s2, 1024 }
  0x39   :  { %p2953_p10 = scmp.ne.s32.totalorder %s3747_s2, %s2952_s16  ;;  %p2956_p11 = scmp.lt.u32.totalorder %s2952_s16, %s3747_s2 }
  0x3b   :  { %p2958_p12 = pnand %p2956_p11, %p2953_p10 }
  0x3d   :  { %2961 = shalt.err (!%p2958_p12)
}
  0x3e   :  { %s2962_s0 = scalar_lea.vmem %s54_s30, 1024  ;;  %p2967_p0 = scmp.lt.s32.totalorder %s54_s30, %s54_s30 }
  0x3f   :  { %p2963_p13 = scmp.ne.s32.totalorder %s54_s30, %s2962_s0  ;;  %p2968_p1 = scmp.lt.s32.totalorder %s2962_s0, %s2962_s0 }
  0x41   :  { %p2969_p2 = por %p2968_p1, %p2967_p0 }
  0x43   :  { %p2970_p3 = pnand %p2969_p2, %p2963_p13 }
  0x45   :  { %2973 = shalt.err (!%p2970_p3)
}
  0x46   :  { %59 = dma.hbm_to_vmem [thread:$0]  %s3747_s2, 1024, %s54_s30, [#allocation6], %s3051_s23, %s3051_s23, %s3052_s24  }
  0x47   :  { %s2974_s25 = scalar_lea.hbm %s3749_s4, 3072 }
  0x48   :  { %p2975_p4 = scmp.ne.s32.totalorder %s3749_s4, %s2974_s25  ;;  %p2978_p5 = scmp.lt.u32.totalorder %s2974_s25, %s3749_s4 }
  0x4a   :  { %p2980_p6 = pnand %p2978_p5, %p2975_p4 }
  0x4c   :  { %2983 = shalt.err (!%p2980_p6)
}
  0x4d   :  { %s2984_s18 = scalar_lea.vmem %s78_s26, 3072  ;;  %p2989_p8 = scmp.lt.s32.totalorder %s78_s26, %s78_s26 }
  0x4e   :  { %p2985_p7 = scmp.ne.s32.totalorder %s78_s26, %s2984_s18  ;;  %p2990_p9 = scmp.lt.s32.totalorder %s2984_s18, %s2984_s18 }
  0x50   :  { %p2991_p10 = por %p2990_p9, %p2989_p8 }
  0x52   :  { %p2992_p11 = pnand %p2991_p10, %p2985_p7 }
  0x54   :  { %2995 = shalt.err (!%p2992_p11)
}
  0x55   :  { %s3059_s2 = smov 192   ;;  %s3060_s30 = smov 12  }
  0x56   :  { %83 = dma.hbm_to_vmem [thread:$0]  %s3749_s4, 3072, %s78_s26, [#allocation9], %s3059_s2, %s3059_s2, %s3060_s30  }
  0x57   :  { %s3061_s0 = smov [#allocation11]   ;;  %s2996_s1 = scalar_lea.hbm %s3751_s6, 3072 }
  0x58   :  { %s91_s15 = sshll.u32 %s3061_s0, 4  ;;  %p2997_p12 = scmp.ne.s32.totalorder %s3751_s6, %s2996_s1  ;;  %s92_s15 = int_to_ptr.vmem [resolvable:$true] %s91_s15 }
  0x59   :  { %p3000_p13 = scmp.lt.u32.totalorder %s2996_s1, %s3751_s6 }
  0x5b   :  { %p3002_p0 = pnand %p3000_p13, %p2997_p12 }
  0x5d   :  { %3005 = shalt.err (!%p3002_p0)
}
  0x5e   :  { %s3006_s17 = scalar_lea.vmem %s92_s15, 3072  ;;  %p3011_p2 = scmp.lt.s32.totalorder %s92_s15, %s92_s15 }
  0x5f   :  { %p3007_p1 = scmp.ne.s32.totalorder %s92_s15, %s3006_s17  ;;  %p3012_p3 = scmp.lt.s32.totalorder %s3006_s17, %s3006_s17 }
  0x61   :  { %p3013_p4 = por %p3012_p3, %p3011_p2 }
  0x63   :  { %p3014_p5 = pnand %p3013_p4, %p3007_p1 }
  0x65   :  { %3017 = shalt.err (!%p3014_p5)
}
  0x66   :  { %97 = dma.hbm_to_vmem [thread:$0]  %s3751_s6, 3072, %s92_s15, [#allocation12], %s3051_s23, %s3051_s23, %s3052_s24  }
  0x67   :  { %3040 = dma.done.wait [#allocation3], 2048  }
  0x68   :  { %3041 = vsyncadd [#allocation3], 4294965248 }
  0x69   :  { %3042 = dma.done.wait [#allocation6], 2048  }
  0x6a   :  { %3043 = vsyncadd [#allocation6], 4294965248 }
  0x6b   :  { %3044 = dma.done.wait [#allocation9], 4096  }
  0x6c   :  { %3045 = vsyncadd [#allocation9], 4294963200 }
  0x6d   :  { %3046 = dma.done.wait [#allocation12], 3072  }
  0x6e   :  { %3047 = vsyncadd [#allocation12], 4294964224  ;;  %v3062_v0 = vmov 0   ;;  %v2787_v1 = vld [vmem:[#allocation10 + $0x8] ss:$12 sps:$4 sm:$0xff]   ;;  %v2818_v18 = vld [vmem:[#allocation8] sm:$0xff]  }
  0x6f   :  { %404 = vmatprep.mubr.bf16.mxu0 %v3062_v0  ;;  %v2788_v2 = vld [vmem:[#allocation10 + $0x4] ss:$12 sps:$4 sm:$0xff]   ;;  %2399 = vmatprep.subr.bf16.mxu1 %v2787_v1  ;;  %v2790_v3 = vld [vmem:[#allocation10] ss:$12 sps:$4 sm:$0xff]   ;;  %v2792_v5 = vld [vmem:[#allocation10 + $0x1c] ss:$12 sps:$4 sm:$0xff]  }
  0x70   :  { %2400 = vmatpush3.bf16.msra.mxu1 %v2787_v1  ;;  %372 = vmatprep.subr.bf16.mxu0 %v2788_v2  ;;  %v2791_v4 = vld [vmem:[#allocation10 + $0x20] ss:$12 sps:$4 sm:$0xff]   ;;  %v2794_v6 = vld [vmem:[#allocation10 + $0x18] ss:$12 sps:$4 sm:$0xff]   ;;  %v2798_v9 = vld [vmem:[#allocation10 + $0x30] ss:$12 sps:$4 sm:$0xff]  }
  0x71   :  { %373 = vmatpush1.bf16.msra.mxu0 %v2790_v3  ;;  %2401 = vmatprep.subr.bf16.mxu1 %v2791_v4  ;;  %v2795_v7 = vld [vmem:[#allocation10 + $0x38] ss:$12 sps:$4 sm:$0xff]   ;;  %v2796_v8 = vld [vmem:[#allocation10 + $0x34] ss:$12 sps:$4 sm:$0xff]   ;;  %v2799_v10 = vld [vmem:[#allocation10 + $0x50] ss:$12 sps:$4 sm:$0xff]  }
  0x72   :  { %374 = vmatprep.subr.bf16.mxu0 %v2792_v5  ;;  %v2800_v11 = vld [vmem:[#allocation10 + $0x4c] ss:$12 sps:$4 sm:$0xff]   ;;  %v2802_v12 = vld [vmem:[#allocation10 + $0x48] ss:$12 sps:$4 sm:$0xff]   ;;  %v2804_v14 = vld [vmem:[#allocation10 + $0x64] ss:$12 sps:$4 sm:$0xff]   ;;  %2415 = vmatprep.mubr.bf16.mxu1 %v2818_v18 }
  0x73   :  { %v2803_v13 = vld [vmem:[#allocation10 + $0x68] ss:$12 sps:$4 sm:$0xff]   ;;  %v2806_v15 = vld [vmem:[#allocation10 + $0x60] ss:$12 sps:$4 sm:$0xff]   ;;  %v2810_v19 = vld [vmem:[#allocation10 + $0x78] ss:$12 sps:$4 sm:$0xff]  }
  0x74   :  { %2402 = vmatpush3.bf16.msra.mxu1 %v2791_v4  ;;  %v2807_v16 = vld [vmem:[#allocation10 + $0x80] ss:$12 sps:$4 sm:$0xff]   ;;  %v2808_v17 = vld [vmem:[#allocation10 + $0x7c] ss:$12 sps:$4 sm:$0xff]   ;;  %v2811_v20 = vld [vmem:[#allocation10 + $0x98] ss:$12 sps:$4 sm:$0xff]  }
  0x75   :  { %375 = vmatpush1.bf16.msra.mxu0 %v2794_v6  ;;  %2403 = vmatprep.subr.bf16.mxu1 %v2795_v7  ;;  %v2812_v21 = vld [vmem:[#allocation10 + $0x94] ss:$12 sps:$4 sm:$0xff]   ;;  %v2814_v22 = vld [vmem:[#allocation10 + $0x90] ss:$12 sps:$4 sm:$0xff]   ;;  %v2816_v24 = vld [vmem:[#allocation10 + $0xac] ss:$12 sps:$4 sm:$0xff]  }
  0x76   :  { %376 = vmatprep.subr.bf16.mxu0 %v2796_v8  ;;  %v2815_v23 = vld [vmem:[#allocation10 + $0xb0] ss:$12 sps:$4 sm:$0xff]   ;;  %v3229_v25 = vld [vmem:[#allocation2] sm:$0xff]  ;;  %v3231_v26 = vld [vmem:[#allocation2 + $0x8] sm:$0xff]  ;;  %vm3064_vm0 = vmmov 0  }
  0x77   :  { %v2819_v27 = vld [vmem:[#allocation10 + $0xa8] ss:$12 sps:$4 sm:$0xff]   ;;  %v598_v28 = vpack.c.bf16 %v3231_v26, %v3229_v25  ;;  %v3237_v30 = vld [vmem:[#allocation2 + $0x18] sm:$0xff]  ;;  %v3241_v34 = vld [vmem:[#allocation2 + $0x20] sm:$0xff] }
  0x78   :  { %2404 = vmatpush3.bf16.msra.mxu1 %v2795_v7  ;;  %v3235_v29 = vld [vmem:[#allocation2 + $0x10] sm:$0xff]  ;;  %v2820_v31 = vld [vmem:[#allocation8 + $0x8] sm:$0xff]   ;;  %v2822_v36 = vld [vmem:[#allocation8 + $0x18] sm:$0xff]  }
  0x79   :  { %377 = vmatpush1.bf16.msra.mxu0 %v2798_v9  ;;  %2405 = vmatprep.subr.bf16.mxu1 %v2799_v10  ;;  %v2821_v32 = vld [vmem:[#allocation8 + $0x10] sm:$0xff]   ;;  %v599_v33 = vpack.c.bf16 %v3237_v30, %v3235_v29  ;;  %v3243_v35 = vld [vmem:[#allocation2 + $0x28] sm:$0xff]  ;;  %v3250_v39 = vld [vmem:[#allocation2 + $0x38] sm:$0xff] }
  0x7a   :  { %378 = vmatprep.subr.bf16.mxu0 %v2800_v11  ;;  %v600_v37 = vpack.c.bf16 %v3243_v35, %v3241_v34  ;;  %v3247_v38 = vld [vmem:[#allocation2 + $0x30] sm:$0xff]  ;;  %v2823_v40 = vld [vmem:[#allocation8 + $0x20] sm:$0xff]   ;;  %v3256_v43 = vld [vmem:[#allocation2 + $0x48] sm:$0xff] }
  0x7b   :  { %v3252_v41 = vld [vmem:[#allocation2 + $0x40] sm:$0xff]  ;;  %v601_v42 = vpack.c.bf16 %v3250_v39, %v3247_v38  ;;  %v3258_v44 = vld [vmem:[#allocation2 + $0x50] sm:$0xff]  ;;  %v3260_v45 = vld [vmem:[#allocation2 + $0x58] sm:$0xff] }
  0x7c   :  { %2406 = vmatpush3.bf16.msra.mxu1 %v2799_v10  ;;  %v2824_v46 = vld [vmem:[#allocation8 + $0x28] sm:$0xff]   ;;  %v602_v47 = vpack.c.bf16 %v3256_v43, %v3252_v41  ;;  %v2825_v48 = vld [vmem:[#allocation8 + $0x30] sm:$0xff]   ;;  %v3265_v49 = vld [vmem:[#allocation2 + $0x60] sm:$0xff]  ;;  %v603_v51 = vpack.c.bf16 %v3260_v45, %v3258_v44 }
  0x7d   :  { %379 = vmatpush1.bf16.msra.mxu0 %v2802_v12  ;;  %2407 = vmatprep.subr.bf16.mxu1 %v2803_v13  ;;  %v3267_v50 = vld [vmem:[#allocation2 + $0x68] sm:$0xff]  ;;  %v3271_v52 = vld [vmem:[#allocation2 + $0x70] sm:$0xff]  ;;  %v3273_v53 = vld [vmem:[#allocation2 + $0x78] sm:$0xff] }
  0x7e   :  { %380 = vmatprep.subr.bf16.mxu0 %v2804_v14  ;;  %v2826_v54 = vld [vmem:[#allocation8 + $0x38] sm:$0xff]   ;;  %v604_v55 = vpack.c.bf16 %v3267_v50, %v3265_v49  ;;  %v3278_v56 = vld [vmem:[#allocation5] sm:$0xff]   ;;  %v605_v57 = vpack.c.bf16 %v3273_v53, %v3271_v52  ;;  %v3284_v58 = vld [vmem:[#allocation5 + $0x8] sm:$0xff]  }
  0x7f   :  { %3773 = vst [vmem:[#allocation19_spill] sm:$0xff] %v3278_v56  ;;  %v3286_v59 = vld [vmem:[#allocation5 + $0x10] sm:$0xff]   ;;  %v3291_v60 = vld [vmem:[#allocation5 + $0x18] sm:$0xff]   ;;  %v3293_v61 = vld [vmem:[#allocation5 + $0x20] sm:$0xff]  }
  0x80   :  { %2408 = vmatpush3.bf16.msra.mxu1 %v2803_v13  ;;  %v3298_v62 = vld [vmem:[#allocation5 + $0x28] sm:$0xff]   ;;  %v3300_v63 = vld [vmem:[#allocation5 + $0x30] sm:$0xff]   ;;  %v3305_v1 = vld [vmem:[#allocation5 + $0x38] sm:$0xff]  }
  0x81   :  { %381 = vmatpush1.bf16.msra.mxu0 %v2806_v15  ;;  %2409 = vmatprep.subr.bf16.mxu1 %v2807_v16  ;;  %v3308_v2 = vld [vmem:[#allocation7] sm:$0xff]   ;;  %v2844_v4 = vld [vmem:[#allocation11 + $0x8] sm:$0xff]   ;;  %v2845_v5 = vld [vmem:[#allocation11 + $0x10] sm:$0xff]  }
  0x82   :  { %382 = vmatprep.subr.bf16.mxu0 %v2808_v17  ;;  %v2843_v3 = vld [vmem:[#allocation11] sm:$0xff]   ;;  %v2846_v6 = vld [vmem:[#allocation11 + $0x18] sm:$0xff]   ;;  %v2848_v7 = vld [vmem:[#allocation11 + $0x28] sm:$0xff]  }
  0x84   :  { %2410 = vmatpush3.bf16.msra.mxu1 %v2807_v16  ;;  %v181_v16 = vlaneseq }
  0x85   :  { %383 = vmatpush1.bf16.msra.mxu0 %v2810_v19  ;;  %2411 = vmatprep.subr.bf16.mxu1 %v2811_v20 }
  0x86   :  { %384 = vmatprep.subr.bf16.mxu0 %v2812_v21 }
  0x88   :  { %2412 = vmatpush3.bf16.msra.mxu1 %v2811_v20  ;;  %v3321_v20 = vshrl.u32 %v181_v16, 7 }
  0x89   :  { %385 = vmatpush1.bf16.msra.mxu0 %v2814_v22  ;;  %2413 = vmatprep.subr.bf16.mxu1 %v2815_v23 }
  0x8a   :  { %386 = vmatprep.subr.bf16.mxu0 %v2816_v24  ;;  %v3760_v22 = vsub.s32 0, %v3321_v20 }
  0x8c   :  { %2414 = vmatpush3.bf16.msra.mxu1 %v2815_v23  ;;  %v3329_v23 = vld [vmem:[%s3750_s5] sm:$0x7] }
  0x8d   :  { %387 = vmatpush1.bf16.msra.mxu0 %v2819_v27  ;;  %2431 = vmatprep.subr.bf16.mxu1 %v598_v28 }
  0x8f   :  { %2416 = vmatmul.mubr.bf16.vlgmr.msra.gmra.mrb[0].mxu1 %v2820_v31 }
  0x90   :  { %2432 = vmatpush3.bf16.msra.mxu1 %v598_v28  ;;  %405 = vmatmul.mubr.bf16.vlgmr.msra.gmra.mrb[0].mxu0 %v2818_v18 }
  0x91   :  { %2433 = vmatprep.subr.bf16.mxu1 %v599_v33  ;;  %2419 = vmatprep.mubr.bf16.mxu1 %v2821_v32 }
  0x92   :  { %414 = vmatprep.mubr.bf16.mxu0 %v3062_v0 }
  0x94   :  { %2434 = vmatpush3.bf16.msra.mxu1 %v599_v33 }
  0x95   :  { %2435 = vmatprep.subr.bf16.mxu1 %v600_v37 }
  0x97   :  { %2420 = vmatmul.mubr.bf16.gmra.mrb[4].mxu1 %v2822_v36 }
  0x98   :  { %2436 = vmatpush3.bf16.msra.mxu1 %v600_v37  ;;  %415 = vmatmul.mubr.bf16.gmra.mrb[4].mxu0 %v2820_v31  ;;  %v3336_v31 = vrot.slane %v3329_v23, %v3760_v22 }
  0x99   :  { %2437 = vmatprep.subr.bf16.mxu1 %v601_v42  ;;  %2423 = vmatprep.mubr.bf16.mxu1 %v2823_v40 }
  0x9a   :  { %424 = vmatprep.mubr.bf16.mxu0 %v3062_v0 }
  0x9c   :  { %2438 = vmatpush3.bf16.msra.mxu1 %v601_v42 }
  0x9d   :  { %2439 = vmatprep.subr.bf16.mxu1 %v602_v47 }
  0x9f   :  { %2424 = vmatmul.mubr.bf16.gmra.mrb[8].mxu1 %v2824_v46 }
  0xa0   :  { %2440 = vmatpush3.bf16.msra.mxu1 %v602_v47  ;;  %425 = vmatmul.mubr.bf16.gmra.mrb[8].mxu0 %v2821_v32 }
  0xa1   :  { %2441 = vmatprep.subr.bf16.mxu1 %v603_v51  ;;  %2427 = vmatprep.mubr.bf16.mxu1 %v2825_v48 }
  0xa2   :  { %434 = vmatprep.mubr.bf16.mxu0 %v3062_v0 }
  0xa4   :  { %2442 = vmatpush3.bf16.msra.mxu1 %v603_v51 }
  0xa5   :  { %2443 = vmatprep.subr.bf16.mxu1 %v604_v55 }
  0xa7   :  { %2428 = vmatmul.mubr.bf16.gmra.mrb[12].mxu1 %v2826_v54 }
  0xa8   :  { %2444 = vmatpush3.bf16.msra.mxu1 %v604_v55  ;;  %435 = vmatmul.mubr.bf16.gmra.mrb[12].mxu0 %v2822_v36 }
  0xa9   :  { %2445 = vmatprep.subr.bf16.mxu1 %v605_v57  ;;  %2447 = vmatprep.mubr.bf16.mxu1 %v3278_v56 }
  0xaa   :  { %444 = vmatprep.mubr.bf16.mxu0 %v3062_v0 }
  0xac   :  { %2446 = vmatpush3.bf16.msra.mxu1 %v605_v57 }
  0xad   :  { %2495 = vmatprep.subr.bf16.mxu1 %v2843_v3 }
  0xaf   :  { %2448 = vmatmul.mubr.bf16.vlgmr.msra.gmra.mrb[16].mxu1 %v3284_v58 }
  0xb0   :  { %445 = vmatmul.mubr.bf16.gmra.mrb[16].mxu0 %v2823_v40  ;;  %2451 = vmatprep.mubr.bf16.mxu1 %v3286_v59 }
  0xb1   :  { %454 = vmatprep.mubr.bf16.mxu0 %v3062_v0  ;;  %2496 = vmatpush3.bf16.msra.mxu1 %v2843_v3 }
  0xb2   :  { %2497 = vmatprep.subr.bf16.mxu1 %v2844_v4 }
  0xb5   :  { %2498 = vmatpush3.bf16.msra.mxu1 %v2844_v4 }
  0xb6   :  { %2499 = vmatprep.subr.bf16.mxu1 %v2845_v5 }
  0xb7   :  { %2452 = vmatmul.mubr.bf16.gmra.mrb[20].mxu1 %v3291_v60 }
  0xb8   :  { %455 = vmatmul.mubr.bf16.gmra.mrb[20].mxu0 %v2824_v46  ;;  %2455 = vmatprep.mubr.bf16.mxu1 %v3293_v61 }
  0xb9   :  { %464 = vmatprep.mubr.bf16.mxu0 %v3062_v0  ;;  %2500 = vmatpush3.bf16.msra.mxu1 %v2845_v5 }
  0xba   :  { %2501 = vmatprep.subr.bf16.mxu1 %v2846_v6 }
  0xbd   :  { %2502 = vmatpush3.bf16.msra.mxu1 %v2846_v6 }
  0xbf   :  { %2456 = vmatmul.mubr.bf16.gmra.mrb[24].mxu1 %v3298_v62 }
  0xc0   :  { %465 = vmatmul.mubr.bf16.gmra.mrb[24].mxu0 %v2825_v48  ;;  %2459 = vmatprep.mubr.bf16.mxu1 %v3300_v63 }
  0xc1   :  { %474 = vmatprep.mubr.bf16.mxu0 %v3062_v0  ;;  %v2847_v0 = vld [vmem:[#allocation11 + $0x20] sm:$0xff]  }
  0xc2   :  { %2503 = vmatprep.subr.bf16.mxu1 %v2847_v0 }
  0xc3   :  { %2504 = vmatpush3.bf16.msra.mxu1 %v2847_v0 }
  0xc4   :  { %2505 = vmatprep.subr.bf16.mxu1 %v2848_v7 }
  0xc7   :  { %2460 = vmatmul.mubr.bf16.gmra.mrb[28].mxu1 %v3305_v1 }
  0xc8   :  { %475 = vmatmul.mubr.bf16.gmra.mrb[28].mxu0 %v2826_v54  ;;  %2506 = vmatpush3.bf16.msra.mxu1 %v2848_v7 }
  0xc9   :  { %2479 = vmatprep.mubr.bf16.mxu0 %v3308_v2 }
 0x163   :  { %v406_v8 = vpop.f32.mrb[0].mxu0 }
 0x164   :  { %v3311_v9 = vpop.f32.mrb[1].mxu0  ;;  %v407_v36 = vadd.f32 %v406_v8, %v3336_v31 }
 0x165   :  { %v410_v10 = vpop.f32.mrb[2].mxu0 }
 0x166   :  { %v3313_v11 = vpop.f32.mrb[3].mxu0  ;;  %v411_v48 = vadd.f32 %v410_v10, %v3336_v31 }
 0x16b   :  { %v416_v12 = vpop.f32.mrb[4].mxu0 }
 0x16c   :  { %v3315_v13 = vpop.f32.mrb[5].mxu0  ;;  %v417_v33 = vadd.f32 %v416_v12, %v3336_v31 }
 0x16d   :  { %v420_v14 = vpop.f32.mrb[6].mxu0 }
 0x16e   :  { %v3317_v15 = vpop.f32.mrb[7].mxu0  ;;  %v421_v40 = vadd.f32 %v420_v14, %v3336_v31 }
 0x173   :  { %v426_v17 = vpop.f32.mrb[8].mxu0 }
 0x174   :  { %v3319_v18 = vpop.f32.mrb[9].mxu0  ;;  %v427_v10 = vadd.f32 %v426_v17, %v3336_v31 }
 0x175   :  { %v430_v19 = vpop.f32.mrb[10].mxu0 }
 0x176   :  { %v3323_v21 = vpop.f32.mrb[11].mxu0 }
 0x17b   :  { %v436_v24 = vpop.f32.mrb[12].mxu0 }
 0x17c   :  { %v3331_v27 = vpop.f32.mrb[13].mxu0  ;;  %v437_v16 = vadd.f32 %v436_v24, %v3336_v31 }
 0x17d   :  { %v440_v28 = vpop.f32.mrb[14].mxu0 }
 0x17e   :  { %v3338_v32 = vpop.f32.mrb[15].mxu0 }
 0x182   :  { %v2449_v37 = vpop.f32.mrb[16].mxu1 }
 0x183   :  { %v713_v42 = vadd.f32 %v2449_v37, %v417_v33  ;;  %v704_v46 = vpop.f32.mrb[17].mxu1  ;;  %v446_v47 = vpop.f32.mrb[16].mxu0 }
 0x184   :  { %v705_v51 = vadd.f32 %v704_v46, %v407_v36  ;;  %v2450_v54 = vpop.f32.mrb[18].mxu1  ;;  %v3344_v55 = vpop.f32.mrb[17].mxu0 }
 0x185   :  { %v716_v57 = vadd.f32 %v2450_v54, %v421_v40  ;;  %v707_v3 = vpop.f32.mrb[19].mxu1  ;;  %v450_v4 = vpop.f32.mrb[18].mxu0  ;;  %v769_v0 = vmax.f32 %v713_v42, 0.0  ;;  %v441_v40 = vadd.f32 %v440_v28, %v3336_v31 }
 0x186   :  { %v708_v5 = vadd.f32 %v707_v3, %v411_v48  ;;  %v3346_v6 = vpop.f32.mrb[19].mxu0  ;;  %v767_v8 = vmax.f32 %v705_v51, 0.0  ;;  %v431_v48 = vadd.f32 %v430_v19, %v3336_v31 }
 0x187   :  { %v770_v7 = vmax.f32 %v716_v57, 0.0 }
 0x188   :  { %v768_v12 = vmax.f32 %v708_v5, 0.0 }
 0x189   :  { %v800_v14 = vpack.c.bf16 %v770_v7, %v769_v0 }
 0x18a   :  { %v799_v33 = vpack.c.bf16 %v768_v12, %v767_v8  ;;  %v2453_v36 = vpop.f32.mrb[20].mxu1 }
 0x18b   :  { %v720_v37 = vpop.f32.mrb[21].mxu1  ;;  %v729_v46 = vadd.f32 %v2453_v36, %v437_v16  ;;  %v456_v54 = vpop.f32.mrb[20].mxu0 }
 0x18c   :  { %v721_v3 = vadd.f32 %v720_v37, %v427_v10  ;;  %v2454_v22 = vpop.f32.mrb[22].mxu1  ;;  %2463 = vmatprep.subr.bf16.mxu0 %v799_v33  ;;  %v3352_v42 = vpop.f32.mrb[21].mxu0  ;;  %v457_v19 = vadd.f32 %v456_v54, %v3336_v31  ;;  %v447_v10 = vadd.f32 %v446_v47, %v3336_v31 }
 0x18d   :  { %v723_v51 = vpop.f32.mrb[23].mxu1  ;;  %2464 = vmatpush3.bf16.msra.mxu0 %v799_v33  ;;  %v732_v57 = vadd.f32 %v2454_v22, %v441_v40  ;;  %v460_v24 = vpop.f32.mrb[22].mxu0  ;;  %v773_v0 = vmax.f32 %v729_v46, 0.0 }
 0x18e   :  { %v724_v5 = vadd.f32 %v723_v51, %v431_v48  ;;  %2465 = vmatprep.subr.bf16.mxu0 %v800_v14  ;;  %v3354_v17 = vpop.f32.mrb[23].mxu0  ;;  %v771_v8 = vmax.f32 %v721_v3, 0.0  ;;  %v461_v22 = vadd.f32 %v460_v24, %v3336_v31  ;;  %v451_v48 = vadd.f32 %v450_v4, %v3336_v31 }
 0x18f   :  { %v774_v7 = vmax.f32 %v732_v57, 0.0 }
 0x190   :  { %v772_v28 = vmax.f32 %v724_v5, 0.0 }
 0x191   :  { %2466 = vmatpush3.bf16.msra.mxu0 %v800_v14  ;;  %v802_v12 = vpack.c.bf16 %v774_v7, %v773_v0 }
 0x192   :  { %v801_v16 = vpack.c.bf16 %v772_v28, %v771_v8  ;;  %v2457_v36 = vpop.f32.mrb[24].mxu1 }
 0x193   :  { %v736_v37 = vpop.f32.mrb[25].mxu1  ;;  %v745_v33 = vadd.f32 %v2457_v36, %v457_v19  ;;  %v466_v40 = vpop.f32.mrb[24].mxu0 }
 0x194   :  { %v737_v51 = vadd.f32 %v736_v37, %v447_v10  ;;  %v2458_v46 = vpop.f32.mrb[26].mxu1  ;;  %2467 = vmatprep.subr.bf16.mxu0 %v801_v16  ;;  %v3360_v3 = vpop.f32.mrb[25].mxu0  ;;  %v467_v19 = vadd.f32 %v466_v40, %v3336_v31 }
 0x195   :  { %v739_v14 = vpop.f32.mrb[27].mxu1  ;;  %2468 = vmatpush3.bf16.msra.mxu0 %v801_v16  ;;  %v748_v54 = vadd.f32 %v2458_v46, %v461_v22  ;;  %v470_v57 = vpop.f32.mrb[26].mxu0  ;;  %v777_v0 = vmax.f32 %v745_v33, 0.0 }
 0x196   :  { %v740_v5 = vadd.f32 %v739_v14, %v451_v48  ;;  %2469 = vmatprep.subr.bf16.mxu0 %v802_v12  ;;  %v3362_v47 = vpop.f32.mrb[27].mxu0  ;;  %v775_v8 = vmax.f32 %v737_v51, 0.0  ;;  %v471_v16 = vadd.f32 %v470_v57, %v3336_v31 }
 0x197   :  { %v778_v7 = vmax.f32 %v748_v54, 0.0 }
 0x198   :  { %v776_v24 = vmax.f32 %v740_v5, 0.0 }
 0x199   :  { %2470 = vmatpush3.bf16.msra.mxu0 %v802_v12  ;;  %v804_v28 = vpack.c.bf16 %v778_v7, %v777_v0 }
 0x19a   :  { %v803_v4 = vpack.c.bf16 %v776_v24, %v775_v8  ;;  %v2461_v10 = vpop.f32.mrb[28].mxu1 }
 0x19b   :  { %v752_v36 = vpop.f32.mrb[29].mxu1  ;;  %v476_v37 = vpop.f32.mrb[28].mxu0 }
 0x19c   :  { %v753_v22 = vadd.f32 %v752_v36, %v467_v19  ;;  %v2462_v46 = vpop.f32.mrb[30].mxu1  ;;  %2471 = vmatprep.subr.bf16.mxu0 %v803_v4  ;;  %v477_v48 = vadd.f32 %v476_v37, %v3336_v31  ;;  %v3367_v14 = vpop.f32.mrb[29].mxu0  ;;  %v3380_v37 = vld [vmem:[#allocation7 + $0x20] sm:$0xff]  }
 0x19d   :  { %v755_v33 = vpop.f32.mrb[31].mxu1  ;;  %2472 = vmatpush3.bf16.msra.mxu0 %v803_v4  ;;  %v480_v51 = vpop.f32.mrb[30].mxu0  ;;  %v3372_v4 = vld [vmem:[#allocation7 + $0x8] sm:$0xff]  }
 0x19e   :  { %v761_v12 = vadd.f32 %v2461_v10, %v477_v48  ;;  %v756_v54 = vadd.f32 %v755_v33, %v471_v16  ;;  %v481_v5 = vadd.f32 %v480_v51, %v3336_v31  ;;  %2473 = vmatprep.subr.bf16.mxu0 %v804_v28  ;;  %v3370_v40 = vpop.f32.mrb[31].mxu0  ;;  %v779_v0 = vmax.f32 %v753_v22, 0.0  ;;  %v3374_v10 = vld [vmem:[#allocation7 + $0x10] sm:$0xff]   ;;  %v3378_v31 = vld [vmem:[#allocation7 + $0x18] sm:$0xff]  }
 0x19f   :  { %v3386_v16 = vld [vmem:[#allocation7 + $0x30] sm:$0xff]   ;;  %v3390_v22 = vld [vmem:[#allocation7 + $0x38] sm:$0xff]  }
 0x1a0   :  { %v780_v7 = vmax.f32 %v756_v54, 0.0  ;;  %v764_v57 = vadd.f32 %v2462_v46, %v481_v5  ;;  %v781_v8 = vmax.f32 %v761_v12, 0.0  ;;  %3774 = vst [vmem:[#allocation20_spill] sm:$0xff] %v3390_v22  ;;  %v2849_v46 = vld [vmem:[#allocation11 + $0x30] sm:$0xff]   ;;  %v2850_v48 = vld [vmem:[#allocation11 + $0x38] sm:$0xff]  }
 0x1a1   :  { %2474 = vmatpush3.bf16.msra.mxu0 %v804_v28  ;;  %v3384_v28 = vld [vmem:[#allocation7 + $0x28] sm:$0xff]   ;;  %2507 = vmatprep.subr.bf16.mxu1 %v2849_v46 }
 0x1a2   :  { %v805_v24 = vpack.c.bf16 %v780_v7, %v779_v0  ;;  %v782_v19 = vmax.f32 %v764_v57, 0.0  ;;  %2508 = vmatpush3.bf16.msra.mxu1 %v2849_v46 }
 0x1a3   :  { %2509 = vmatprep.subr.bf16.mxu1 %v2850_v48 }
 0x1a4   :  { %2475 = vmatprep.subr.bf16.mxu0 %v805_v24  ;;  %v806_v36 = vpack.c.bf16 %v782_v19, %v781_v8 }
 0x1a5   :  { %2476 = vmatpush3.bf16.msra.mxu0 %v805_v24 }
 0x1a6   :  { %2477 = vmatprep.subr.bf16.mxu0 %v806_v36  ;;  %2510 = vmatpush3.bf16.msra.mxu1 %v2850_v48 }
 0x1a9   :  { %2478 = vmatpush3.bf16.msra.mxu0 %v806_v36 }
 0x1ac   :  { %2480 = vmatmul.mubr.bf16.vlgmr.msra.gmra.mrb[32].mxu0 %v3372_v4 }
 0x1ad   :  { %2483 = vmatprep.mubr.bf16.mxu0 %v3374_v10 }
 0x1b4   :  { %2484 = vmatmul.mubr.bf16.gmra.mrb[36].mxu0 %v3378_v31 }
 0x1b5   :  { %2487 = vmatprep.mubr.bf16.mxu0 %v3380_v37 }
 0x1bc   :  { %2488 = vmatmul.mubr.bf16.gmra.mrb[40].mxu0 %v3384_v28 }
 0x1bd   :  { %2491 = vmatprep.mubr.bf16.mxu0 %v3386_v16 }
 0x1c4   :  { %2492 = vmatmul.mubr.bf16.gmra.mrb[44].mxu0 %v3390_v22 }
 0x1c5   :  { %2543 = vmatprep.mubr.bf16.mxu0 %v3278_v56 }
 0x27f   :  { %v2481_v33 = vpop.f32.mrb[32].mxu0 }
 0x280   :  { %v889_v51 = vpop.f32.mrb[33].mxu0  ;;  %v954_v54 = vadd.f32 %v2481_v33, %v3235_v29 }
 0x281   :  { %v2482_v12 = vpop.f32.mrb[34].mxu0  ;;  %v952_v7 = vadd.f32 %v889_v51, %v3229_v25 }
 0x282   :  { %v955_v5 = vadd.f32 %v2482_v12, %v3237_v30  ;;  %v892_v0 = vpop.f32.mrb[35].mxu0 }
 0x283   :  { %v953_v57 = vadd.f32 %v892_v0, %v3231_v26 }
 0x284   :  { %v969_v8 = vpack.c.bf16 %v955_v5, %v954_v54 }
 0x285   :  { %v968_v24 = vpack.c.bf16 %v953_v57, %v952_v7 }
 0x287   :  { %v2485_v19 = vpop.f32.mrb[36].mxu0  ;;  %2511 = vmatprep.mubr.bf16.mxu1 %v968_v24 }
 0x288   :  { %v905_v36 = vpop.f32.mrb[37].mxu0  ;;  %2512 = vmatmul.mubr.bf16.vlgmr.msra.gmra.mrb[32].mxu1 %v969_v8  ;;  %v958_v48 = vadd.f32 %v2485_v19, %v3247_v38 }
 0x289   :  { %v2486_v46 = vpop.f32.mrb[38].mxu0  ;;  %v956_v29 = vadd.f32 %v905_v36, %v3241_v34 }
 0x28a   :  { %v959_v56 = vadd.f32 %v2486_v46, %v3250_v39  ;;  %v908_v22 = vpop.f32.mrb[39].mxu0 }
 0x28b   :  { %v957_v30 = vadd.f32 %v908_v22, %v3243_v35 }
 0x28c   :  { %v971_v33 = vpack.c.bf16 %v959_v56, %v958_v48 }
 0x28d   :  { %v970_v25 = vpack.c.bf16 %v957_v30, %v956_v29 }
 0x28f   :  { %v2489_v51 = vpop.f32.mrb[40].mxu0  ;;  %2515 = vmatprep.mubr.bf16.mxu1 %v970_v25 }
 0x290   :  { %v921_v26 = vpop.f32.mrb[41].mxu0  ;;  %2516 = vmatmul.mubr.bf16.gmra.mrb[36].mxu1 %v971_v33  ;;  %v962_v54 = vadd.f32 %v2489_v51, %v3258_v44 }
 0x291   :  { %v2490_v12 = vpop.f32.mrb[42].mxu0  ;;  %v960_v38 = vadd.f32 %v921_v26, %v3252_v41 }
 0x292   :  { %v963_v5 = vadd.f32 %v2490_v12, %v3260_v45  ;;  %v924_v0 = vpop.f32.mrb[43].mxu0 }
 0x293   :  { %v961_v39 = vadd.f32 %v924_v0, %v3256_v43  ;;  %v2197_v43 = vld [vmem:[%s3752_s7] ss:$0 sm:$0xff] }
 0x294   :  { %v973_v7 = vpack.c.bf16 %v963_v5, %v962_v54 }
 0x295   :  { %v972_v34 = vpack.c.bf16 %v961_v39, %v960_v38 }
 0x297   :  { %v2493_v57 = vpop.f32.mrb[44].mxu0  ;;  %2519 = vmatprep.mubr.bf16.mxu1 %v972_v34 }
 0x298   :  { %v937_v35 = vpop.f32.mrb[45].mxu0  ;;  %2520 = vmatmul.mubr.bf16.gmra.mrb[40].mxu1 %v973_v7  ;;  %v966_v22 = vadd.f32 %v2493_v57, %v3271_v52 }
 0x299   :  { %v2494_v56 = vpop.f32.mrb[46].mxu0  ;;  %v964_v44 = vadd.f32 %v937_v35, %v3265_v49 }
 0x29a   :  { %v967_v8 = vadd.f32 %v2494_v56, %v3273_v53  ;;  %v940_v24 = vpop.f32.mrb[47].mxu0 }
 0x29b   :  { %v965_v45 = vadd.f32 %v940_v24, %v3267_v50 }
 0x29c   :  { %v975_v19 = vpack.c.bf16 %v967_v8, %v966_v22 }
 0x29d   :  { %v974_v41 = vpack.c.bf16 %v965_v45, %v964_v44 }
 0x29f   :  { %2523 = vmatprep.mubr.bf16.mxu1 %v974_v41 }
 0x2a0   :  { %2524 = vmatmul.mubr.bf16.gmra.mrb[44].mxu1 %v975_v19 }
 0x2a1   :  { %2575 = vmatprep.mubr.bf16.mxu1 %v3308_v2 }
 0x35b   :  { %v2513_v36 = vpop.f32.mrb[32].mxu1 }
 0x35c   :  { %v1081_v46 = vpop.f32.mrb[33].mxu1  ;;  %v3418_v29 = vadd.f32 %v2513_v36, %v2197_v43 }
 0x35d   :  { %v3414_v52 = vadd.f32 %v2197_v43, %v1081_v46  ;;  %v2514_v53 = vpop.f32.mrb[34].mxu1 }
 0x35e   :  { %v3416_v48 = vadd.f32 %v2514_v53, %v2197_v43  ;;  %v1084_v49 = vpop.f32.mrb[35].mxu1  ;;  %v1146_v51 = vmax.f32 %v3418_v29, 0.0 }
 0x35f   :  { %v3420_v50 = vadd.f32 %v2197_v43, %v1084_v49  ;;  %v1144_v30 = vmax.f32 %v3414_v52, 0.0 }
 0x360   :  { %v1147_v33 = vmax.f32 %v3416_v48, 0.0 }
 0x361   :  { %v1145_v25 = vmax.f32 %v3420_v50, 0.0 }
 0x362   :  { %v1161_v5 = vpack.c.bf16 %v1147_v33, %v1146_v51 }
 0x363   :  { %v1160_v26 = vpack.c.bf16 %v1145_v25, %v1144_v30  ;;  %v2517_v12 = vpop.f32.mrb[36].mxu1 }
 0x364   :  { %v1097_v54 = vpop.f32.mrb[37].mxu1  ;;  %v3438_v34 = vadd.f32 %v2517_v12, %v2197_v43 }
 0x365   :  { %v3434_v0 = vadd.f32 %v2197_v43, %v1097_v54  ;;  %v2518_v38 = vpop.f32.mrb[38].mxu1  ;;  %2527 = vmatprep.subr.bf16.mxu0 %v1160_v26 }
 0x366   :  { %v3436_v39 = vadd.f32 %v2518_v38, %v2197_v43  ;;  %v1100_v7 = vpop.f32.mrb[39].mxu1  ;;  %2528 = vmatpush3.bf16.msra.mxu0 %v1160_v26  ;;  %v3769_v8 = vmax.f32 %v3438_v34, 0.0  ;;  %v3777_v29 = vmax.f32 %v3438_v34, 0.0 }
 0x367   :  { %v3440_v57 = vadd.f32 %v2197_v43, %v1100_v7  ;;  %2529 = vmatprep.subr.bf16.mxu0 %v1161_v5  ;;  %v3765_v35 = vmax.f32 %v3434_v0, 0.0  ;;  %v3779_v52 = vmax.f32 %v3434_v0, 0.0 }
 0x368   :  { %v3766_v56 = vmax.f32 %v3436_v39, 0.0  ;;  %v3778_v48 = vmax.f32 %v3436_v39, 0.0 }
 0x369   :  { %v3764_v22 = vmax.f32 %v3440_v57, 0.0  ;;  %v3780_v50 = vmax.f32 %v3440_v57, 0.0 }
 0x36a   :  { %2530 = vmatpush3.bf16.msra.mxu0 %v1161_v5  ;;  %v1163_v19 = vpack.c.bf16 %v3766_v56, %v3769_v8 }
 0x36b   :  { %v1162_v24 = vpack.c.bf16 %v3764_v22, %v3765_v35  ;;  %v2521_v44 = vpop.f32.mrb[40].mxu1 }
 0x36c   :  { %v1113_v45 = vpop.f32.mrb[41].mxu1  ;;  %v3458_v49 = vadd.f32 %v2521_v44, %v2197_v43 }
 0x36d   :  { %v3454_v41 = vadd.f32 %v2197_v43, %v1113_v45  ;;  %v2522_v36 = vpop.f32.mrb[42].mxu1  ;;  %2531 = vmatprep.subr.bf16.mxu0 %v1162_v24 }
 0x36e   :  { %v3456_v46 = vadd.f32 %v2522_v36, %v2197_v43  ;;  %v1116_v53 = vpop.f32.mrb[43].mxu1  ;;  %2532 = vmatpush3.bf16.msra.mxu0 %v1162_v24  ;;  %v1154_v38 = vmax.f32 %v3458_v49, 0.0 }
 0x36f   :  { %v3460_v26 = vadd.f32 %v2197_v43, %v1116_v53  ;;  %2533 = vmatprep.subr.bf16.mxu0 %v1163_v19  ;;  %v3768_v12 = vmax.f32 %v3454_v41, 0.0  ;;  %v3781_v0 = vmax.f32 %v3454_v41, 0.0 }
 0x370   :  { %v1155_v54 = vmax.f32 %v3456_v46, 0.0 }
 0x371   :  { %v3767_v5 = vmax.f32 %v3460_v26, 0.0  ;;  %v3782_v57 = vmax.f32 %v3460_v26, 0.0 }
 0x372   :  { %2534 = vmatpush3.bf16.msra.mxu0 %v1163_v19  ;;  %v1165_v45 = vpack.c.bf16 %v1155_v54, %v1154_v38 }
 0x373   :  { %v1164_v7 = vpack.c.bf16 %v3767_v5, %v3768_v12  ;;  %v2525_v24 = vpop.f32.mrb[44].mxu1 }
 0x374   :  { %v1129_v44 = vpop.f32.mrb[45].mxu1  ;;  %v3478_v35 = vadd.f32 %v2525_v24, %v2197_v43  ;;  %v2852_v24 = vld [vmem:[#allocation11 + $0x48] sm:$0xff]  }
 0x375   :  { %v3474_v36 = vadd.f32 %v2197_v43, %v1129_v44  ;;  %v2526_v53 = vpop.f32.mrb[46].mxu1  ;;  %2535 = vmatprep.subr.bf16.mxu0 %v1164_v7 }
 0x376   :  { %v3476_v22 = vadd.f32 %v2526_v53, %v2197_v43  ;;  %v1132_v19 = vpop.f32.mrb[47].mxu1  ;;  %2536 = vmatpush3.bf16.msra.mxu0 %v1164_v7  ;;  %v1158_v44 = vmax.f32 %v3478_v35, 0.0  ;;  %v2851_v7 = vld [vmem:[#allocation11 + $0x40] sm:$0xff]  }
 0x377   :  { %v3480_v56 = vadd.f32 %v2197_v43, %v1132_v19  ;;  %2537 = vmatprep.subr.bf16.mxu0 %v1165_v45  ;;  %v3771_v5 = vmax.f32 %v3474_v36, 0.0  ;;  %v3784_v41 = vmax.f32 %v3474_v36, 0.0  ;;  %v2207_v35 = vld [vmem:[%s3752_s7 + $0x1] ss:$0 sm:$0xff] }
 0x378   :  { %v3772_v12 = vmax.f32 %v3476_v22, 0.0  ;;  %v3783_v46 = vmax.f32 %v3476_v22, 0.0 }
 0x379   :  { %v3770_v8 = vmax.f32 %v3480_v56, 0.0  ;;  %v3785_v26 = vmax.f32 %v3480_v56, 0.0 }
 0x37a   :  { %2538 = vmatpush3.bf16.msra.mxu0 %v1165_v45  ;;  %v1167_v43 = vpack.c.bf16 %v3772_v12, %v1158_v44  ;;  %v2853_v45 = vld [vmem:[#allocation11 + $0x50] sm:$0xff]  }
 0x37b   :  { %v1166_v53 = vpack.c.bf16 %v3770_v8, %v3771_v5 }
 0x37d   :  { %2539 = vmatprep.subr.bf16.mxu0 %v1166_v53 }
 0x37e   :  { %2540 = vmatpush3.bf16.msra.mxu0 %v1166_v53 }
 0x37f   :  { %2541 = vmatprep.subr.bf16.mxu0 %v1167_v43 }
 0x382   :  { %2542 = vmatpush3.bf16.msra.mxu0 %v1167_v43 }
 0x383   :  { %2591 = vmatprep.subr.bf16.mxu0 %v2851_v7 }
 0x385   :  { %2544 = vmatmul.mubr.bf16.vlgmr.msra.gmra.mrb[48].mxu0 %v3284_v58  ;;  %v2854_v58 = vld [vmem:[#allocation11 + $0x58] sm:$0xff]  }
 0x386   :  { %2547 = vmatprep.mubr.bf16.mxu0 %v3286_v59  ;;  %2592 = vmatpush3.bf16.msra.mxu0 %v2851_v7  ;;  %v2855_v59 = vld [vmem:[#allocation11 + $0x60] sm:$0xff]  }
 0x387   :  { %2593 = vmatprep.subr.bf16.mxu0 %v2852_v24 }
 0x38a   :  { %2594 = vmatpush3.bf16.msra.mxu0 %v2852_v24 }
 0x38b   :  { %2595 = vmatprep.subr.bf16.mxu0 %v2853_v45 }
 0x38d   :  { %2548 = vmatmul.mubr.bf16.gmra.mrb[52].mxu0 %v3291_v60  ;;  %v2856_v60 = vld [vmem:[#allocation11 + $0x68] sm:$0xff]  }
 0x38e   :  { %2551 = vmatprep.mubr.bf16.mxu0 %v3293_v61  ;;  %2596 = vmatpush3.bf16.msra.mxu0 %v2853_v45  ;;  %v187_v61 = vsub.s32 1, %v3321_v20 }
 0x38f   :  { %2597 = vmatprep.subr.bf16.mxu0 %v2854_v58 }
 0x392   :  { %2598 = vmatpush3.bf16.msra.mxu0 %v2854_v58 }
 0x393   :  { %2599 = vmatprep.subr.bf16.mxu0 %v2855_v59 }
 0x395   :  { %2552 = vmatmul.mubr.bf16.gmra.mrb[56].mxu0 %v3298_v62  ;;  %v3503_v62 = vrot.slane %v3329_v23, %v187_v61 }
 0x396   :  { %2555 = vmatprep.mubr.bf16.mxu0 %v3300_v63  ;;  %2600 = vmatpush3.bf16.msra.mxu0 %v2855_v59 }
 0x397   :  { %2601 = vmatprep.subr.bf16.mxu0 %v2856_v60  ;;  %v419_v63 = vadd.f32 %v3315_v13, %v3503_v62  ;;  %v423_v53 = vadd.f32 %v3317_v15, %v3503_v62  ;;  %v413_v24 = vadd.f32 %v3313_v11, %v3503_v62  ;;  %v429_v15 = vadd.f32 %v3319_v18, %v3503_v62 }
 0x398   :  { %v443_v11 = vadd.f32 %v3338_v32, %v3503_v62  ;;  %v459_v32 = vadd.f32 %v3352_v42, %v3503_v62 }
 0x39a   :  { %2602 = vmatpush3.bf16.msra.mxu0 %v2856_v60 }
 0x39d   :  { %2556 = vmatmul.mubr.bf16.gmra.mrb[60].mxu0 %v3305_v1  ;;  %v409_v1 = vadd.f32 %v3311_v9, %v3503_v62  ;;  %v439_v9 = vadd.f32 %v3331_v27, %v3503_v62 }
 0x458   :  { %v2545_v19 = vpop.f32.mrb[48].mxu0 }
 0x459   :  { %v1211_v43 = vadd.f32 %v2545_v19, %v419_v63  ;;  %v1202_v7 = vpop.f32.mrb[49].mxu0 }
 0x45a   :  { %v1203_v45 = vadd.f32 %v1202_v7, %v409_v1  ;;  %v2546_v58 = vpop.f32.mrb[50].mxu0 }
 0x45b   :  { %v1214_v59 = vadd.f32 %v2546_v58, %v423_v53  ;;  %v1205_v23 = vpop.f32.mrb[51].mxu0  ;;  %v1267_v61 = vmax.f32 %v1211_v43, 0.0  ;;  %v433_v43 = vadd.f32 %v3323_v21, %v3503_v62  ;;  %v449_v21 = vadd.f32 %v3344_v55, %v3503_v62 }
 0x45c   :  { %v1206_v60 = vadd.f32 %v1205_v23, %v413_v24  ;;  %v1265_v13 = vmax.f32 %v1203_v45, 0.0 }
 0x45d   :  { %v1268_v8 = vmax.f32 %v1214_v59, 0.0 }
 0x45e   :  { %v1266_v5 = vmax.f32 %v1206_v60, 0.0 }
 0x45f   :  { %v1282_v12 = vpack.c.bf16 %v1268_v8, %v1267_v61 }
 0x460   :  { %v1281_v63 = vpack.c.bf16 %v1266_v5, %v1265_v13  ;;  %v2549_v19 = vpop.f32.mrb[52].mxu0  ;;  %v463_v13 = vadd.f32 %v3354_v17, %v3503_v62  ;;  %v479_v17 = vadd.f32 %v3367_v14, %v3503_v62 }
 0x461   :  { %v1227_v1 = vadd.f32 %v2549_v19, %v439_v9  ;;  %v1218_v53 = vpop.f32.mrb[53].mxu0 }
 0x462   :  { %v1219_v7 = vadd.f32 %v1218_v53, %v429_v15  ;;  %v2550_v24 = vpop.f32.mrb[54].mxu0  ;;  %2559 = vmatprep.subr.bf16.mxu1 %v1281_v63 }
 0x463   :  { %v1230_v45 = vadd.f32 %v2550_v24, %v443_v11  ;;  %v1221_v58 = vpop.f32.mrb[55].mxu0  ;;  %2560 = vmatpush3.bf16.msra.mxu1 %v1281_v63  ;;  %v1271_v8 = vmax.f32 %v1227_v1, 0.0  ;;  %v453_v63 = vadd.f32 %v3346_v6, %v3503_v62  ;;  %v469_v6 = vadd.f32 %v3360_v3, %v3503_v62 }
 0x464   :  { %v1222_v27 = vadd.f32 %v1221_v58, %v433_v43  ;;  %2561 = vmatprep.subr.bf16.mxu1 %v1282_v12  ;;  %v1269_v5 = vmax.f32 %v1219_v7, 0.0 }
 0x465   :  { %v1272_v18 = vmax.f32 %v1230_v45, 0.0 }
 0x466   :  { %v1270_v59 = vmax.f32 %v1222_v27, 0.0  ;;  %v483_v27 = vadd.f32 %v3370_v40, %v3503_v62 }
 0x467   :  { %v1284_v23 = vpack.c.bf16 %v1272_v18, %v1271_v8  ;;  %2562 = vmatpush3.bf16.msra.mxu1 %v1282_v12 }
 0x468   :  { %v1283_v60 = vpack.c.bf16 %v1270_v59, %v1269_v5  ;;  %v2553_v61 = vpop.f32.mrb[56].mxu0  ;;  %v473_v5 = vadd.f32 %v3362_v47, %v3503_v62  ;;  %v3775_v47 = vld [vmem:[#allocation20_spill] sm:$0xff]  ;;  %v3776_v62 = vld [vmem:[#allocation19_spill] sm:$0xff] }
 0x469   :  { %v1243_v9 = vadd.f32 %v2553_v61, %v459_v32  ;;  %v1234_v15 = vpop.f32.mrb[57].mxu0 }
 0x46a   :  { %v1235_v19 = vadd.f32 %v1234_v15, %v449_v21  ;;  %v2554_v11 = vpop.f32.mrb[58].mxu0  ;;  %2563 = vmatprep.subr.bf16.mxu1 %v1283_v60  ;;  %v2857_v15 = vld [vmem:[#allocation11 + $0x70] sm:$0xff]  }
 0x46b   :  { %v1246_v1 = vadd.f32 %v2554_v11, %v463_v13  ;;  %v1237_v42 = vpop.f32.mrb[59].mxu0  ;;  %2564 = vmatpush3.bf16.msra.mxu1 %v1283_v60  ;;  %v1275_v53 = vmax.f32 %v1243_v9, 0.0  ;;  %2603 = vmatprep.subr.bf16.mxu0 %v2857_v15 }
 0x46c   :  { %v1238_v12 = vadd.f32 %v1237_v42, %v453_v63  ;;  %2565 = vmatprep.subr.bf16.mxu1 %v1284_v23  ;;  %v1273_v43 = vmax.f32 %v1235_v19, 0.0  ;;  %2604 = vmatpush3.bf16.msra.mxu0 %v2857_v15  ;;  %v2858_v63 = vld [vmem:[#allocation11 + $0x78] sm:$0xff]  }
 0x46d   :  { %v1276_v55 = vmax.f32 %v1246_v1, 0.0  ;;  %2605 = vmatprep.subr.bf16.mxu0 %v2858_v63 }
 0x46e   :  { %v1274_v7 = vmax.f32 %v1238_v12, 0.0 }
 0x46f   :  { %v1286_v24 = vpack.c.bf16 %v1276_v55, %v1275_v53  ;;  %2566 = vmatpush3.bf16.msra.mxu1 %v1284_v23 }
 0x470   :  { %v1285_v45 = vpack.c.bf16 %v1274_v7, %v1273_v43  ;;  %v2557_v58 = vpop.f32.mrb[60].mxu0  ;;  %2606 = vmatpush3.bf16.msra.mxu0 %v2858_v63 }
 0x471   :  { %v1259_v8 = vadd.f32 %v2557_v58, %v479_v17  ;;  %v1250_v18 = vpop.f32.mrb[61].mxu0 }
 0x472   :  { %v1251_v59 = vadd.f32 %v1250_v18, %v469_v6  ;;  %v2558_v32 = vpop.f32.mrb[62].mxu0  ;;  %2567 = vmatprep.subr.bf16.mxu1 %v1285_v45 }
 0x473   :  { %v1262_v21 = vadd.f32 %v2558_v32, %v483_v27  ;;  %v1253_v14 = vpop.f32.mrb[63].mxu0  ;;  %2568 = vmatpush3.bf16.msra.mxu1 %v1285_v45  ;;  %v1279_v60 = vmax.f32 %v1259_v8, 0.0 }
 0x474   :  { %v1254_v23 = vadd.f32 %v1253_v14, %v473_v5  ;;  %2569 = vmatprep.subr.bf16.mxu1 %v1286_v24  ;;  %v1277_v61 = vmax.f32 %v1251_v59, 0.0 }
 0x475   :  { %v1280_v3 = vmax.f32 %v1262_v21, 0.0 }
 0x476   :  { %v1278_v13 = vmax.f32 %v1254_v23, 0.0 }
 0x477   :  { %v1288_v9 = vpack.c.bf16 %v1280_v3, %v1279_v60  ;;  %2570 = vmatpush3.bf16.msra.mxu1 %v1286_v24 }
 0x478   :  { %v1287_v40 = vpack.c.bf16 %v1278_v13, %v1277_v61 }
 0x47a   :  { %2571 = vmatprep.subr.bf16.mxu1 %v1287_v40 }
 0x47b   :  { %2572 = vmatpush3.bf16.msra.mxu1 %v1287_v40 }
 0x47c   :  { %2573 = vmatprep.subr.bf16.mxu1 %v1288_v9 }
 0x47f   :  { %2574 = vmatpush3.bf16.msra.mxu1 %v1288_v9 }
 0x482   :  { %2576 = vmatmul.mubr.bf16.vlgmr.msra.gmra.mrb[48].mxu1 %v3372_v4 }
 0x483   :  { %2579 = vmatprep.mubr.bf16.mxu1 %v3374_v10 }
 0x48a   :  { %2580 = vmatmul.mubr.bf16.gmra.mrb[52].mxu1 %v3378_v31 }
 0x48b   :  { %2583 = vmatprep.mubr.bf16.mxu1 %v3380_v37 }
 0x492   :  { %2584 = vmatmul.mubr.bf16.gmra.mrb[56].mxu1 %v3384_v28 }
 0x493   :  { %2587 = vmatprep.mubr.bf16.mxu1 %v3386_v16 }
 0x49a   :  { %2588 = vmatmul.mubr.bf16.gmra.mrb[60].mxu1 %v3775_v47 }
 0x49b   :  { %2639 = vmatprep.mubr.bf16.mxu1 %v3776_v62 }
 0x555   :  { %v2577_v19 = vpop.f32.mrb[48].mxu1 }
 0x556   :  { %v1323_v11 = vpop.f32.mrb[49].mxu1  ;;  %v1388_v42 = vadd.f32 %v2577_v19, %v1146_v51 }
 0x557   :  { %v2578_v1 = vpop.f32.mrb[50].mxu1  ;;  %v1386_v55 = vadd.f32 %v1323_v11, %v1144_v30 }
 0x558   :  { %v1389_v12 = vadd.f32 %v2578_v1, %v1147_v33  ;;  %v1326_v53 = vpop.f32.mrb[51].mxu1 }
 0x559   :  { %v1387_v43 = vadd.f32 %v1326_v53, %v1145_v25 }
 0x55a   :  { %v1403_v7 = vpack.c.bf16 %v1389_v12, %v1388_v42 }
 0x55b   :  { %v1402_v17 = vpack.c.bf16 %v1387_v43, %v1386_v55 }
 0x55d   :  { %v2581_v24 = vpop.f32.mrb[52].mxu1  ;;  %2607 = vmatprep.mubr.bf16.mxu0 %v1402_v17 }
 0x55e   :  { %v1339_v6 = vpop.f32.mrb[53].mxu1  ;;  %2608 = vmatmul.mubr.bf16.vlgmr.msra.gmra.mrb[64].mxu0 %v1403_v7  ;;  %v1392_v51 = vadd.f32 %v2581_v24, %v3777_v29 }
 0x55f   :  { %v2582_v45 = vpop.f32.mrb[54].mxu1  ;;  %v1390_v30 = vadd.f32 %v1339_v6, %v3779_v52 }
 0x560   :  { %v1393_v33 = vadd.f32 %v2582_v45, %v3778_v48  ;;  %v1342_v58 = vpop.f32.mrb[55].mxu1 }
 0x561   :  { %v1391_v25 = vadd.f32 %v1342_v58, %v3780_v50 }
 0x562   :  { %v1405_v27 = vpack.c.bf16 %v1393_v33, %v1392_v51 }
 0x563   :  { %v1404_v8 = vpack.c.bf16 %v1391_v25, %v1390_v30 }
 0x565   :  { %v2585_v18 = vpop.f32.mrb[56].mxu1  ;;  %2611 = vmatprep.mubr.bf16.mxu0 %v1404_v8 }
 0x566   :  { %v1355_v5 = vpop.f32.mrb[57].mxu1  ;;  %2612 = vmatmul.mubr.bf16.gmra.mrb[68].mxu0 %v1405_v27  ;;  %v1396_v34 = vadd.f32 %v2585_v18, %v1154_v38 }
 0x567   :  { %v2586_v59 = vpop.f32.mrb[58].mxu1  ;;  %v1394_v21 = vadd.f32 %v1355_v5, %v3781_v0 }
 0x568   :  { %v1397_v39 = vadd.f32 %v2586_v59, %v1155_v54  ;;  %v1358_v32 = vpop.f32.mrb[59].mxu1 }
 0x569   :  { %v1395_v14 = vadd.f32 %v1358_v32, %v3782_v57 }
 0x56a   :  { %v1407_v23 = vpack.c.bf16 %v1397_v39, %v1396_v34 }
 0x56b   :  { %v1406_v60 = vpack.c.bf16 %v1395_v14, %v1394_v21 }
 0x56d   :  { %v2589_v3 = vpop.f32.mrb[60].mxu1  ;;  %2615 = vmatprep.mubr.bf16.mxu0 %v1406_v60 }
 0x56e   :  { %v1371_v61 = vpop.f32.mrb[61].mxu1  ;;  %2616 = vmatmul.mubr.bf16.gmra.mrb[72].mxu0 %v1407_v23  ;;  %v1400_v49 = vadd.f32 %v2589_v3, %v1158_v44 }
 0x56f   :  { %v2590_v13 = vpop.f32.mrb[62].mxu1  ;;  %v1398_v9 = vadd.f32 %v1371_v61, %v3784_v41 }
 0x570   :  { %v1401_v54 = vadd.f32 %v2590_v13, %v3783_v46  ;;  %v1374_v38 = vpop.f32.mrb[63].mxu1 }
 0x571   :  { %v1399_v40 = vadd.f32 %v1374_v38, %v3785_v26 }
 0x572   :  { %v1409_v62 = vpack.c.bf16 %v1401_v54, %v1400_v49 }
 0x573   :  { %v1408_v15 = vpack.c.bf16 %v1399_v40, %v1398_v9 }
 0x575   :  { %2619 = vmatprep.mubr.bf16.mxu0 %v1408_v15 }
 0x576   :  { %2620 = vmatmul.mubr.bf16.gmra.mrb[76].mxu0 %v1409_v62 }
 0x577   :  { %2671 = vmatprep.mubr.bf16.mxu0 %v3308_v2 }
 0x631   :  { %v2609_v44 = vpop.f32.mrb[64].mxu0 }
 0x632   :  { %v1517_v22 = vpop.f32.mrb[65].mxu0  ;;  %v3585_v56 = vadd.f32 %v2609_v44, %v2207_v35  ;;  %v2878_v44 = vld [vmem:[#allocation5 + $0x8] sm:$0xff]  }
 0x633   :  { %v3581_v63 = vadd.f32 %v2207_v35, %v1517_v22  ;;  %v2610_v19 = vpop.f32.mrb[66].mxu0  ;;  %v2879_v22 = vld [vmem:[#allocation5 + $0x10] sm:$0xff]  }
 0x634   :  { %v3583_v36 = vadd.f32 %v2610_v19, %v2207_v35  ;;  %v1520_v11 = vpop.f32.mrb[67].mxu0  ;;  %v1582_v53 = vmax.f32 %v3585_v56, 0.0  ;;  %v2880_v19 = vld [vmem:[#allocation5 + $0x18] sm:$0xff]  }
 0x635   :  { %v3587_v1 = vadd.f32 %v2207_v35, %v1520_v11  ;;  %v1580_v42 = vmax.f32 %v3581_v63, 0.0  ;;  %v2881_v11 = vld [vmem:[#allocation5 + $0x20] sm:$0xff]  }
 0x636   :  { %v1583_v2 = vmax.f32 %v3583_v36, 0.0 }
 0x637   :  { %v1581_v12 = vmax.f32 %v3587_v1, 0.0 }
 0x638   :  { %v1597_v17 = vpack.c.bf16 %v1583_v2, %v1582_v53 }
 0x639   :  { %v1596_v55 = vpack.c.bf16 %v1581_v12, %v1580_v42  ;;  %v2613_v43 = vpop.f32.mrb[68].mxu0 }
 0x63a   :  { %v1533_v7 = vpop.f32.mrb[69].mxu0  ;;  %v3605_v51 = vadd.f32 %v2613_v43, %v2207_v35  ;;  %v2883_v43 = vld [vmem:[#allocation5 + $0x30] sm:$0xff]  }
 0x63b   :  { %v3601_v24 = vadd.f32 %v2207_v35, %v1533_v7  ;;  %v2614_v6 = vpop.f32.mrb[70].mxu0  ;;  %2623 = vmatprep.subr.bf16.mxu1 %v1596_v55  ;;  %v2884_v7 = vld [vmem:[#allocation5 + $0x38] sm:$0xff]  }
 0x63c   :  { %v3603_v45 = vadd.f32 %v2614_v6, %v2207_v35  ;;  %v1536_v29 = vpop.f32.mrb[71].mxu0  ;;  %2624 = vmatpush3.bf16.msra.mxu1 %v1596_v55  ;;  %v1586_v30 = vmax.f32 %v3605_v51, 0.0  ;;  %v2882_v55 = vld [vmem:[#allocation5 + $0x28] sm:$0xff]  }
 0x63d   :  { %v3607_v48 = vadd.f32 %v2207_v35, %v1536_v29  ;;  %2625 = vmatprep.subr.bf16.mxu1 %v1597_v17  ;;  %v1584_v33 = vmax.f32 %v3601_v24, 0.0  ;;  %v2860_v6 = vld [vmem:[#allocation11 + $0x88] sm:$0xff]   ;;  %v2861_v29 = vld [vmem:[#allocation11 + $0x90] sm:$0xff]  }
 0x63e   :  { %v1587_v58 = vmax.f32 %v3603_v45, 0.0 }
 0x63f   :  { %v1585_v52 = vmax.f32 %v3607_v48, 0.0 }
 0x640   :  { %2626 = vmatpush3.bf16.msra.mxu1 %v1597_v17  ;;  %v1599_v8 = vpack.c.bf16 %v1587_v58, %v1586_v30  ;;  %v2859_v17 = vld [vmem:[#allocation11 + $0x80] sm:$0xff]  }
 0x641   :  { %v1598_v50 = vpack.c.bf16 %v1585_v52, %v1584_v33  ;;  %v2617_v25 = vpop.f32.mrb[72].mxu0 }
 0x642   :  { %v1549_v27 = vpop.f32.mrb[73].mxu0  ;;  %v3625_v39 = vadd.f32 %v2617_v25, %v2207_v35  ;;  %v2863_v25 = vld [vmem:[#allocation11 + $0xa0] sm:$0xff]  }
 0x643   :  { %v3621_v18 = vadd.f32 %v2207_v35, %v1549_v27  ;;  %v2618_v5 = vpop.f32.mrb[74].mxu0  ;;  %2627 = vmatprep.subr.bf16.mxu1 %v1598_v50  ;;  %v2864_v27 = vld [vmem:[#allocation11 + $0xa8] sm:$0xff]  }
 0x644   :  { %v3623_v59 = vadd.f32 %v2618_v5, %v2207_v35  ;;  %v1552_v34 = vpop.f32.mrb[75].mxu0  ;;  %2628 = vmatpush3.bf16.msra.mxu1 %v1598_v50  ;;  %v1590_v14 = vmax.f32 %v3625_v39, 0.0  ;;  %v2862_v50 = vld [vmem:[#allocation11 + $0x98] sm:$0xff]   ;;  %v2885_v5 = vld [vmem:[%s3750_s5] sm:$0x7] }
 0x645   :  { %v3627_v32 = vadd.f32 %v2207_v35, %v1552_v34  ;;  %2629 = vmatprep.subr.bf16.mxu1 %v1599_v8  ;;  %v1588_v0 = vmax.f32 %v3621_v18, 0.0 }
 0x646   :  { %v1591_v21 = vmax.f32 %v3623_v59, 0.0 }
 0x647   :  { %v1589_v57 = vmax.f32 %v3627_v32, 0.0 }
 0x648   :  { %2630 = vmatpush3.bf16.msra.mxu1 %v1599_v8  ;;  %v1601_v61 = vpack.c.bf16 %v1591_v21, %v1590_v14  ;;  %v191_v8 = vsub.s32 2, %v3321_v20 }
 0x649   :  { %v1600_v23 = vpack.c.bf16 %v1589_v57, %v1588_v0  ;;  %v2621_v60 = vpop.f32.mrb[76].mxu0 }
 0x64a   :  { %v1565_v3 = vpop.f32.mrb[77].mxu0  ;;  %v3645_v38 = vadd.f32 %v2621_v60, %v2207_v35  ;;  %v192_v34 = vrot.slane %v2885_v5, %v191_v8 }
 0x64b   :  { %v3641_v13 = vadd.f32 %v2207_v35, %v1565_v3  ;;  %v2622_v49 = vpop.f32.mrb[78].mxu0  ;;  %2631 = vmatprep.subr.bf16.mxu1 %v1600_v23 }
 0x64c   :  { %v3643_v46 = vadd.f32 %v2622_v49, %v2207_v35  ;;  %v1568_v54 = vpop.f32.mrb[79].mxu0  ;;  %2632 = vmatpush3.bf16.msra.mxu1 %v1600_v23  ;;  %v1594_v62 = vmax.f32 %v3645_v38, 0.0 }
 0x64d   :  { %v3647_v41 = vadd.f32 %v2207_v35, %v1568_v54  ;;  %2633 = vmatprep.subr.bf16.mxu1 %v1601_v61  ;;  %v1592_v9 = vmax.f32 %v3641_v13, 0.0 }
 0x64e   :  { %v1595_v26 = vmax.f32 %v3643_v46, 0.0  ;;  %v2217_v46 = vld [vmem:[%s3752_s7 + $0x2] ss:$0 sm:$0xff] }
 0x64f   :  { %v1593_v40 = vmax.f32 %v3647_v41, 0.0 }
 0x650   :  { %2634 = vmatpush3.bf16.msra.mxu1 %v1601_v61  ;;  %v1603_v35 = vpack.c.bf16 %v1595_v26, %v1594_v62 }
 0x651   :  { %v1602_v15 = vpack.c.bf16 %v1593_v40, %v1592_v9 }
 0x653   :  { %2635 = vmatprep.subr.bf16.mxu1 %v1602_v15 }
 0x654   :  { %2636 = vmatpush3.bf16.msra.mxu1 %v1602_v15 }
 0x655   :  { %2637 = vmatprep.subr.bf16.mxu1 %v1603_v35 }
 0x658   :  { %2638 = vmatpush3.bf16.msra.mxu1 %v1603_v35 }
 0x659   :  { %2687 = vmatprep.subr.bf16.mxu1 %v2859_v17 }
 0x65b   :  { %2640 = vmatmul.mubr.bf16.vlgmr.msra.gmra.mrb[0].mxu1 %v2878_v44 }
 0x65c   :  { %2643 = vmatprep.mubr.bf16.mxu1 %v2879_v22  ;;  %2688 = vmatpush3.bf16.msra.mxu1 %v2859_v17 }
 0x65d   :  { %2689 = vmatprep.subr.bf16.mxu1 %v2860_v6 }
 0x660   :  { %2690 = vmatpush3.bf16.msra.mxu1 %v2860_v6 }
 0x661   :  { %2691 = vmatprep.subr.bf16.mxu1 %v2861_v29 }
 0x663   :  { %2644 = vmatmul.mubr.bf16.gmra.mrb[4].mxu1 %v2880_v19 }
 0x664   :  { %2647 = vmatprep.mubr.bf16.mxu1 %v2881_v11  ;;  %2692 = vmatpush3.bf16.msra.mxu1 %v2861_v29 }
 0x665   :  { %2693 = vmatprep.subr.bf16.mxu1 %v2862_v50 }
 0x668   :  { %2694 = vmatpush3.bf16.msra.mxu1 %v2862_v50 }
 0x669   :  { %2695 = vmatprep.subr.bf16.mxu1 %v2863_v25 }
 0x66b   :  { %2648 = vmatmul.mubr.bf16.gmra.mrb[8].mxu1 %v2882_v55 }
 0x66c   :  { %2651 = vmatprep.mubr.bf16.mxu1 %v2883_v43  ;;  %2696 = vmatpush3.bf16.msra.mxu1 %v2863_v25 }
 0x66d   :  { %2697 = vmatprep.subr.bf16.mxu1 %v2864_v27 }
 0x670   :  { %2698 = vmatpush3.bf16.msra.mxu1 %v2864_v27 }
 0x673   :  { %2652 = vmatmul.mubr.bf16.gmra.mrb[12].mxu1 %v2884_v7 }
 0x72e   :  { %v2641_v23 = vpop.f32.mrb[0].mxu1 }
 0x72f   :  { %v2739_v60 = vadd.f32 %v2641_v23, %v192_v34  ;;  %v1638_v3 = vpop.f32.mrb[1].mxu1 }
 0x730   :  { %v2740_v61 = vadd.f32 %v1638_v3, %v192_v34  ;;  %v2642_v49 = vpop.f32.mrb[2].mxu1 }
 0x731   :  { %v2741_v54 = vadd.f32 %v2642_v49, %v192_v34  ;;  %v1641_v15 = vpop.f32.mrb[3].mxu1  ;;  %v1703_v44 = vmax.f32 %v2739_v60, 0.0 }
 0x732   :  { %v2742_v35 = vadd.f32 %v1641_v15, %v192_v34  ;;  %v1701_v19 = vmax.f32 %v2740_v61, 0.0 }
 0x733   :  { %v1704_v22 = vmax.f32 %v2741_v54, 0.0 }
 0x734   :  { %v1702_v11 = vmax.f32 %v2742_v35, 0.0 }
 0x735   :  { %v1718_v55 = vpack.c.bf16 %v1704_v22, %v1703_v44 }
 0x736   :  { %v1717_v43 = vpack.c.bf16 %v1702_v11, %v1701_v19  ;;  %v2645_v7 = vpop.f32.mrb[4].mxu1 }
 0x737   :  { %v2743_v17 = vadd.f32 %v2645_v7, %v192_v34  ;;  %v1654_v6 = vpop.f32.mrb[5].mxu1 }
 0x738   :  { %v2744_v29 = vadd.f32 %v1654_v6, %v192_v34  ;;  %v2646_v50 = vpop.f32.mrb[6].mxu1  ;;  %2655 = vmatprep.subr.bf16.mxu0 %v1717_v43 }
 0x739   :  { %v2745_v25 = vadd.f32 %v2646_v50, %v192_v34  ;;  %v1657_v27 = vpop.f32.mrb[7].mxu1  ;;  %2656 = vmatpush3.bf16.msra.mxu0 %v1717_v43  ;;  %v1707_v5 = vmax.f32 %v2743_v17, 0.0 }
 0x73a   :  { %v2746_v8 = vadd.f32 %v1657_v27, %v192_v34  ;;  %2657 = vmatprep.subr.bf16.mxu0 %v1718_v55  ;;  %v1705_v3 = vmax.f32 %v2744_v29, 0.0 }
 0x73b   :  { %v1708_v23 = vmax.f32 %v2745_v25, 0.0 }
 0x73c   :  { %v1706_v60 = vmax.f32 %v2746_v8, 0.0 }
 0x73d   :  { %v1720_v49 = vpack.c.bf16 %v1708_v23, %v1707_v5  ;;  %2658 = vmatpush3.bf16.msra.mxu0 %v1718_v55 }
 0x73e   :  { %v1719_v61 = vpack.c.bf16 %v1706_v60, %v1705_v3  ;;  %v2649_v54 = vpop.f32.mrb[8].mxu1 }
 0x73f   :  { %v2747_v15 = vadd.f32 %v2649_v54, %v192_v34  ;;  %v1670_v35 = vpop.f32.mrb[9].mxu1 }
 0x740   :  { %v2748_v44 = vadd.f32 %v1670_v35, %v192_v34  ;;  %v2650_v22 = vpop.f32.mrb[10].mxu1  ;;  %2659 = vmatprep.subr.bf16.mxu0 %v1719_v61 }
 0x741   :  { %v2749_v19 = vadd.f32 %v2650_v22, %v192_v34  ;;  %v1673_v11 = vpop.f32.mrb[11].mxu1  ;;  %2660 = vmatpush3.bf16.msra.mxu0 %v1719_v61  ;;  %v1711_v43 = vmax.f32 %v2747_v15, 0.0 }
 0x742   :  { %v2750_v7 = vadd.f32 %v1673_v11, %v192_v34  ;;  %2661 = vmatprep.subr.bf16.mxu0 %v1720_v49  ;;  %v1709_v17 = vmax.f32 %v2748_v44, 0.0 }
 0x743   :  { %v1712_v6 = vmax.f32 %v2749_v19, 0.0 }
 0x744   :  { %v1710_v50 = vmax.f32 %v2750_v7, 0.0 }
 0x745   :  { %v1722_v29 = vpack.c.bf16 %v1712_v6, %v1711_v43  ;;  %2662 = vmatpush3.bf16.msra.mxu0 %v1720_v49  ;;  %v2866_v49 = vld [vmem:[#allocation11 + $0xb8] sm:$0xff]  }
 0x746   :  { %v1721_v25 = vpack.c.bf16 %v1710_v50, %v1709_v17  ;;  %v2653_v55 = vpop.f32.mrb[12].mxu1 }
 0x747   :  { %v2751_v27 = vadd.f32 %v2653_v55, %v192_v34  ;;  %v1686_v8 = vpop.f32.mrb[13].mxu1 }
 0x748   :  { %v2752_v5 = vadd.f32 %v1686_v8, %v192_v34  ;;  %v2654_v23 = vpop.f32.mrb[14].mxu1  ;;  %2663 = vmatprep.subr.bf16.mxu0 %v1721_v25 }
 0x749   :  { %v2753_v3 = vadd.f32 %v2654_v23, %v192_v34  ;;  %v1689_v60 = vpop.f32.mrb[15].mxu1  ;;  %2664 = vmatpush3.bf16.msra.mxu0 %v1721_v25  ;;  %v1715_v61 = vmax.f32 %v2751_v27, 0.0 }
 0x74a   :  { %v2754_v54 = vadd.f32 %v1689_v60, %v192_v34  ;;  %2665 = vmatprep.subr.bf16.mxu0 %v1722_v29  ;;  %v1713_v15 = vmax.f32 %v2752_v5, 0.0  ;;  %v2865_v34 = vld [vmem:[#allocation11 + $0xb0] sm:$0xff]  }
 0x74b   :  { %v1716_v35 = vmax.f32 %v2753_v3, 0.0  ;;  %2699 = vmatprep.subr.bf16.mxu1 %v2865_v34 }
 0x74c   :  { %v1714_v22 = vmax.f32 %v2754_v54, 0.0  ;;  %2700 = vmatpush3.bf16.msra.mxu1 %v2865_v34 }
 0x74d   :  { %v1724_v44 = vpack.c.bf16 %v1716_v35, %v1715_v61  ;;  %2666 = vmatpush3.bf16.msra.mxu0 %v1722_v29  ;;  %2701 = vmatprep.subr.bf16.mxu1 %v2866_v49 }
 0x74e   :  { %v1723_v19 = vpack.c.bf16 %v1714_v22, %v1713_v15 }
 0x750   :  { %2667 = vmatprep.subr.bf16.mxu0 %v1723_v19  ;;  %2702 = vmatpush3.bf16.msra.mxu1 %v2866_v49 }
 0x751   :  { %2668 = vmatpush3.bf16.msra.mxu0 %v1723_v19 }
 0x752   :  { %2669 = vmatprep.subr.bf16.mxu0 %v1724_v44 }
 0x755   :  { %2670 = vmatpush3.bf16.msra.mxu0 %v1724_v44 }
 0x758   :  { %2672 = vmatmul.mubr.bf16.vlgmr.msra.gmra.mrb[80].mxu0 %v3372_v4 }
 0x759   :  { %2675 = vmatprep.mubr.bf16.mxu0 %v3374_v10 }
 0x760   :  { %2676 = vmatmul.mubr.bf16.gmra.mrb[84].mxu0 %v3378_v31 }
 0x761   :  { %2679 = vmatprep.mubr.bf16.mxu0 %v3380_v37 }
 0x768   :  { %2680 = vmatmul.mubr.bf16.gmra.mrb[88].mxu0 %v3384_v28 }
 0x769   :  { %2683 = vmatprep.mubr.bf16.mxu0 %v3386_v16 }
 0x770   :  { %2684 = vmatmul.mubr.bf16.gmra.mrb[92].mxu0 %v3775_v47 }
 0x82b   :  { %v2673_v11 = vpop.f32.mrb[80].mxu0 }
 0x82c   :  { %v1759_v4 = vpop.f32.mrb[81].mxu0  ;;  %v1824_v10 = vadd.f32 %v2673_v11, %v1582_v53 }
 0x82d   :  { %v2674_v7 = vpop.f32.mrb[82].mxu0  ;;  %v1822_v28 = vadd.f32 %v1759_v4, %v1580_v42 }
 0x82e   :  { %v1825_v31 = vadd.f32 %v2674_v7, %v1583_v2  ;;  %v1762_v37 = vpop.f32.mrb[83].mxu0 }
 0x82f   :  { %v1823_v16 = vadd.f32 %v1762_v37, %v1581_v12 }
 0x830   :  { %v1839_v47 = vpack.c.bf16 %v1825_v31, %v1824_v10 }
 0x831   :  { %v1838_v43 = vpack.c.bf16 %v1823_v16, %v1822_v28 }
 0x833   :  { %v2677_v6 = vpop.f32.mrb[84].mxu0  ;;  %2703 = vmatprep.mubr.bf16.mxu1 %v1838_v43 }
 0x834   :  { %v1775_v17 = vpop.f32.mrb[85].mxu0  ;;  %2704 = vmatmul.mubr.bf16.vlgmr.msra.gmra.mrb[64].mxu1 %v1839_v47  ;;  %v1828_v56 = vadd.f32 %v2677_v6, %v1586_v30 }
 0x835   :  { %v2678_v50 = vpop.f32.mrb[86].mxu0  ;;  %v1826_v63 = vadd.f32 %v1775_v17, %v1584_v33 }
 0x836   :  { %v1829_v36 = vadd.f32 %v2678_v50, %v1587_v58  ;;  %v1778_v2 = vpop.f32.mrb[87].mxu0 }
 0x837   :  { %v1827_v1 = vadd.f32 %v1778_v2, %v1585_v52 }
 0x838   :  { %v1841_v42 = vpack.c.bf16 %v1829_v36, %v1828_v56 }
 0x839   :  { %v1840_v12 = vpack.c.bf16 %v1827_v1, %v1826_v63 }
 0x83b   :  { %v2681_v53 = vpop.f32.mrb[88].mxu0  ;;  %2707 = vmatprep.mubr.bf16.mxu1 %v1840_v12  ;;  %v2867_v12 = vld [vmem:[%s3753_s8] sm:$0xff]  }
 0x83c   :  { %v1791_v29 = vpop.f32.mrb[89].mxu0  ;;  %2708 = vmatmul.mubr.bf16.gmra.mrb[68].mxu1 %v1841_v42  ;;  %v1832_v51 = vadd.f32 %v2681_v53, %v1590_v14  ;;  %v3063_v14 = vmov 0.0   ;;  %v2077_v53 = vld [vmem:[%s3758_s13] sm:$0x1] }
 0x83d   :  { %v2682_v25 = vpop.f32.mrb[90].mxu0  ;;  %v1830_v24 = vadd.f32 %v1791_v29, %v1588_v0  ;;  %2719 = vmatprep.subr.bf16.mxu0 %v3063_v14  ;;  %2735 = vmatprep.mubr.msk.bf16.mxu0 %vm3064_vm0, %v3063_v14  ;;  %v2078_v29 = vadd.f32 1e-05, %v2077_v53 }
 0x83e   :  { %v1833_v45 = vadd.f32 %v2682_v25, %v1591_v21  ;;  %v1794_v58 = vpop.f32.mrb[91].mxu0 }
 0x83f   :  { %v1831_v48 = vadd.f32 %v1794_v58, %v1589_v57  ;;  %2868 = vrsqrt.f32 %v2078_v29  ;;  %v2227_v58 = vld [vmem:[%s3757_s12] ss:$0 sm:$0xff] }
 0x840   :  { %v1843_v33 = vpack.c.bf16 %v1833_v45, %v1832_v51  ;;  %v2073_v51 = vld [vmem:[%s3754_s9] sm:$0xff] }
 0x841   :  { %v1842_v52 = vpack.c.bf16 %v1831_v48, %v1830_v24  ;;  %v2074_v24 = vld [vmem:[%s3754_s9 + $0x8] sm:$0xff]  ;;  %s3065_s9 = smov [#allocation13]  }
 0x843   :  { %v2685_v30 = vpop.f32.mrb[92].mxu0  ;;  %2711 = vmatprep.mubr.bf16.mxu1 %v1842_v52 }
 0x844   :  { %v1807_v55 = vpop.f32.mrb[93].mxu0  ;;  %2712 = vmatmul.mubr.bf16.gmra.mrb[72].mxu1 %v1843_v33  ;;  %v1836_v39 = vadd.f32 %v2685_v30, %v1594_v62  ;;  %v3786_v33 = vsub.s32 0, %v3321_v20 }
 0x845   :  { %v2686_v27 = vpop.f32.mrb[94].mxu0  ;;  %v1834_v18 = vadd.f32 %v1807_v55, %v1592_v9 }
 0x846   :  { %v1837_v59 = vadd.f32 %v2686_v27, %v1595_v26  ;;  %v1810_v21 = vpop.f32.mrb[95].mxu0 }
 0x847   :  { %v1835_v32 = vadd.f32 %v1810_v21, %v1593_v40  ;;  %v2228_v21 = vld [vmem:[%s3755_s10] ss:$0 sm:$0xff]  ;;  %s2134_s10 = sshll.u32 %s3065_s9, 4  ;;  %s2135_s10 = int_to_ptr.vmem [resolvable:$true] %s2134_s10 }
 0x848   :  { %v1845_v0 = vpack.c.bf16 %v1837_v59, %v1836_v39  ;;  %p3023_p7 = scmp.lt.s32.totalorder %s2135_s10, %s2135_s10 }
 0x849   :  { %v1844_v57 = vpack.c.bf16 %v1835_v32, %v1834_v18  ;;  %v2869_v25 = vpop.eup %2868 }
 0x84a   :  { %v2093_v52 = vrot.slane %v2869_v25, %v3786_v33 }
 0x84b   :  { %2715 = vmatprep.mubr.bf16.mxu1 %v1844_v57 }
 0x84c   :  { %2716 = vmatmul.mubr.bf16.gmra.mrb[76].mxu1 %v1845_v0  ;;  %v2229_v0 = vld [vmem:[%s3756_s11] ss:$0 sm:$0xff]  ;;  %s3018_s11 = scalar_lea.vmem %s2135_s10, 256 }
 0x84d   :  { %p3019_p6 = scmp.ne.s32.totalorder %s2135_s10, %s3018_s11  ;;  %p3024_p8 = scmp.lt.s32.totalorder %s3018_s11, %s3018_s11 }
 0x84f   :  { %p3025_p9 = por %p3024_p8, %p3023_p7 }
 0x851   :  { %p3026_p10 = pnand %p3025_p9, %p3019_p6 }
 0x907   :  { %v2705_v38 = vpop.f32.mrb[64].mxu1 }
 0x908   :  { %v1953_v26 = vpop.f32.mrb[65].mxu1  ;;  %v1962_v13 = vadd.f32 %v2705_v38, %v2217_v46 }
 0x909   :  { %v2706_v62 = vpop.f32.mrb[66].mxu1  ;;  %v1954_v41 = vadd.f32 %v2217_v46, %v1953_v26 }
 0x90a   :  { %v1965_v9 = vadd.f32 %v2706_v62, %v2217_v46  ;;  %v1956_v8 = vpop.f32.mrb[67].mxu1 }
 0x90b   :  { %v1957_v40 = vadd.f32 %v2217_v46, %v1956_v8 }
 0x90c   :  { %v2019_v5 = vpack.c.bf16 %v1965_v9, %v1962_v13 }
 0x90d   :  { %v2018_v23 = vpack.c.bf16 %v1957_v40, %v1954_v41 }
 0x90f   :  { %v2709_v3 = vpop.f32.mrb[68].mxu1  ;;  %2720 = vmatpush3.bf16.msra.mxu0 %v2018_v23 }
 0x910   :  { %v1969_v60 = vpop.f32.mrb[69].mxu1  ;;  %2721 = vmatprep.subr.bf16.mxu0 %v3063_v14  ;;  %v1978_v61 = vadd.f32 %v2709_v3, %v2217_v46 }
 0x911   :  { %v2710_v54 = vpop.f32.mrb[70].mxu1  ;;  %v1970_v22 = vadd.f32 %v2217_v46, %v1969_v60 }
 0x912   :  { %v1981_v35 = vadd.f32 %v2710_v54, %v2217_v46  ;;  %v1972_v15 = vpop.f32.mrb[71].mxu1 }
 0x913   :  { %v1973_v44 = vadd.f32 %v2217_v46, %v1972_v15  ;;  %2722 = vmatpush3.bf16.msra.mxu0 %v2019_v5 }
 0x914   :  { %v2021_v19 = vpack.c.bf16 %v1981_v35, %v1978_v61  ;;  %2723 = vmatprep.subr.bf16.mxu0 %v3063_v14 }
 0x915   :  { %v2020_v34 = vpack.c.bf16 %v1973_v44, %v1970_v22 }
 0x917   :  { %v2713_v49 = vpop.f32.mrb[72].mxu1  ;;  %2724 = vmatpush3.bf16.msra.mxu0 %v2020_v34 }
 0x918   :  { %v1985_v11 = vpop.f32.mrb[73].mxu1  ;;  %2725 = vmatprep.subr.bf16.mxu0 %v3063_v14  ;;  %v1994_v7 = vadd.f32 %v2713_v49, %v2217_v46 }
 0x919   :  { %v2714_v4 = vpop.f32.mrb[74].mxu1  ;;  %v1986_v37 = vadd.f32 %v2217_v46, %v1985_v11 }
 0x91a   :  { %v1997_v10 = vadd.f32 %v2714_v4, %v2217_v46  ;;  %v1988_v31 = vpop.f32.mrb[75].mxu1 }
 0x91b   :  { %v1989_v28 = vadd.f32 %v2217_v46, %v1988_v31  ;;  %2726 = vmatpush3.bf16.msra.mxu0 %v2021_v19 }
 0x91c   :  { %v2023_v16 = vpack.c.bf16 %v1997_v10, %v1994_v7  ;;  %2727 = vmatprep.subr.bf16.mxu0 %v3063_v14 }
 0x91d   :  { %v2022_v47 = vpack.c.bf16 %v1989_v28, %v1986_v37 }
 0x91f   :  { %v2717_v43 = vpop.f32.mrb[76].mxu1  ;;  %2728 = vmatpush3.bf16.msra.mxu0 %v2022_v47 }
 0x920   :  { %v2001_v6 = vpop.f32.mrb[77].mxu1  ;;  %2729 = vmatprep.subr.bf16.mxu0 %v3063_v14  ;;  %v2010_v50 = vadd.f32 %v2717_v43, %v2217_v46 }
 0x921   :  { %v2718_v17 = vpop.f32.mrb[78].mxu1  ;;  %v2002_v2 = vadd.f32 %v2217_v46, %v2001_v6 }
 0x922   :  { %v2013_v56 = vadd.f32 %v2718_v17, %v2217_v46  ;;  %v2004_v36 = vpop.f32.mrb[79].mxu1 }
 0x923   :  { %v2005_v63 = vadd.f32 %v2217_v46, %v2004_v36  ;;  %2730 = vmatpush3.bf16.msra.mxu0 %v2023_v16 }
 0x924   :  { %v2025_v1 = vpack.c.bf16 %v2013_v56, %v2010_v50  ;;  %2731 = vmatprep.subr.bf16.mxu0 %v3063_v14 }
 0x925   :  { %v2024_v42 = vpack.c.bf16 %v2005_v63, %v2002_v2 }
 0x927   :  { %2732 = vmatpush3.bf16.msra.mxu0 %v2024_v42 }
 0x928   :  { %2733 = vmatprep.subr.bf16.mxu0 %v3063_v14 }
 0x92b   :  { %2734 = vmatpush3.bf16.msra.mxu0 %v2025_v1 }
 0x92e   :  { %2736 = vmatmul.mubr.bf16.vlgmr.msra.gmra.mrb[96].mxu0 %v2867_v12 }
 0xa01   :  { %v2066_v45 = vpop.f32.mrb[96].mxu0 }
 0xa02   :  { %v2075_v48 = vmul.f32 %v2073_v51, %v2066_v45  ;;  %v2737_v30 = vpop.f32.mrb[97].mxu0 }
 0xa03   :  { %v2069_v55 = vpop.f32.mrb[98].mxu0 }
 0xa04   :  { %v2087_v27 = vsub.f32 %v2075_v48, %v2227_v58  ;;  %v2076_v39 = vmul.f32 %v2074_v24, %v2069_v55  ;;  %v2738_v59 = vpop.f32.mrb[99].mxu0 }
 0xa06   :  { %v2095_v18 = vmul.f32 %v2093_v52, %v2087_v27  ;;  %v2088_v32 = vsub.f32 %v2076_v39, %v2227_v58 }
 0xa08   :  { %v2104_v57 = vmul.f32 %v2228_v21, %v2095_v18  ;;  %v2096_v14 = vmul.f32 %v2093_v52, %v2088_v32 }
 0xa0a   :  { %v2113_v38 = vadd.f32 %v2229_v0, %v2104_v57  ;;  %v2105_v20 = vmul.f32 %v2228_v21, %v2096_v14 }
 0xa0c   :  { %v2115_v46 = vsub.f32 0.0, %v2113_v38  ;;  %v2114_v26 = vadd.f32 %v2229_v0, %v2105_v20 }
 0xa0e   :  { %v2117_v62 = vmul.f32 1.442695, %v2115_v46  ;;  %v2116_v13 = vsub.f32 0.0, %v2114_v26 }
 0xa10   :  { %2870 = vpow2.f32 %v2117_v62  ;;  %v2119_v9 = vmul.f32 1.442695, %v2116_v13 }
 0xa12   :  { %2872 = vpow2.f32 %v2119_v9 }
 0xa1a   :  { %v2871_v8 = vpop.eup %2870 }
 0xa1b   :  { %v2121_v41 = vadd.f32 1.0, %v2871_v8 }
 0xa1c   :  { %v2873_v40 = vpop.eup %2872 }
 0xa1d   :  { %2874 = vrcp.f32 %v2121_v41  ;;  %v2122_v5 = vadd.f32 1.0, %v2873_v40 }
 0xa1f   :  { %2876 = vrcp.f32 %v2122_v5 }
 0xa27   :  { %v2875_v23 = vpop.eup %2874 }
 0xa28   :  { %2127 = vst [vmem:[#allocation13] sm:$0xff] %v2875_v23 }
 0xa29   :  { %v2877_v3 = vpop.eup %2876 }
 0xa2a   :  { %2128 = vst [vmem:[#allocation13 + $0x8] sm:$0xff] %v2877_v3 }
 0xa2b   :  { %3029 = shalt.err (!%p3026_p10)
}
 0xa2c   :  { %s3030_s23 = scalar_lea.hbm %s3759_s14, 256 }
 0xa2d   :  { %p3031_p11 = scmp.ne.s32.totalorder %s3759_s14, %s3030_s23  ;;  %p3034_p12 = scmp.lt.u32.totalorder %s3030_s23, %s3759_s14 }
 0xa2f   :  { %p3036_p13 = pnand %p3034_p12, %p3031_p11 }
 0xa31   :  { %3039 = shalt.err (!%p3036_p13)
}
 0xa32   :  { %2140 = dma.vmem_to_hbm [thread:$0]  %s2135_s10, 256, %s3759_s14, [#allocation4], %s3055_s3, %s3055_s3, %s3056_s28  }
 0xa33   :  { %3048 = dma.done.wait [#allocation4], 256  }
 0xa34   :  { %3049 = vsyncadd [#allocation4], 4294967040 }
 0xa35   :  { %2144 = vsyncpa [#allocation3], 1 }
 0xa36   :  { %2145 = vsyncpa [#allocation6], 1 }
 0xa37   :  { %2146 = vsyncpa [#allocation9], 1 }
 0xa38   :  { %2147 = vsyncpa [#allocation12], 1 }
 0xa39   :  { %2148 = vsyncpa [#allocation4], 1 }

</bundles_post_ra>
